<compile_context>
chip_gen: v5e
topology: v5e:2x2
jax: 0.10.0
libtpu: 0.0.40
codegen_flags: <defaults>
</compile_context>

<pallas_src>
import jax
import jax.numpy as jnp
import numpy as np
from jax import lax
from jax.experimental import pallas as pl
from jax.experimental.pallas import tpu as pltpu


def _sigmoid(z):
    # tanh lowers to the EUP (otherwise-idle slot); avoids a f32 VALU divide.
    return 0.5 * jnp.tanh(0.5 * z) + 0.5


# ----------------------------------------------------------------------------
# Pallas kernel: one (direction, batch-tile, time-chunk) per grid step.
# The recurrence over TC timesteps runs inside the grid step; h/c state is
# carried across chunks in f32 VMEM scratch.
# ----------------------------------------------------------------------------
def _make_lstm_kernel(T, TC, H):
    def kernel(gx_ref, m_ref, whh_ref, h0_ref, out_ref, h_sc, c_sc):
        # gx_ref:  (1, TC, TB, 4H) f32  precomputed x @ W_ih^T + bias
        # m_ref:   (TC, TB, 1)     f32  per-timestep mask (broadcast in-kernel)
        # whh_ref: (1, H, 4H)      bf16 VMEM-resident recurrent weight
        # h0_ref:  (TB, H)         f32  initial hidden state
        # out_ref: (1, TC, TB, H)  f32  hidden outputs for this chunk
        # h_sc, c_sc: (TB, H)      f32  recurrent state (persists across chunks)
        d = pl.program_id(0)           # direction (0 = forward, 1 = backward)
        c = pl.program_id(2)           # time-chunk index (grid order)
        nc = pl.num_programs(2)

        @pl.when(c == 0)
        def _init():
            h_sc[...] = h0_ref[...]
            c_sc[...] = jnp.zeros_like(c_sc)   # c0 is always zero in MyLSTM

        # forward: chunk c ; backward: chunk nc-1-c   (pure int arithmetic)
        t_blk = c + d * (nc - 1 - 2 * c)

        def step(s, carry):
            # forward: local step s ; backward: TC-1-s
            t_local = s + d * (TC - 1 - 2 * s)
            t_glob = t_blk * TC + t_local

            @pl.when(t_glob < T)       # skip zero-padded trailing timesteps
            def _step():
                # Only the recurrent matmul sits on the serial path.
                gates = (gx_ref[0, t_local]
                         + jnp.dot(h_sc[...].astype(jnp.bfloat16),
                                   whh_ref[0],
                                   preferred_element_type=jnp.float32))
                i = _sigmoid(gates[:, 0 * H:1 * H])
                f = _sigmoid(gates[:, 1 * H:2 * H])
                g = jnp.tanh(gates[:, 2 * H:3 * H])
                o = _sigmoid(gates[:, 3 * H:4 * H])

                c_new = f * c_sc[...] + i * g
                h_new = o * jnp.tanh(c_new)

                m_t = m_ref[t_local]            # (TB, 1) -> broadcast over H
                h_new = h_new * m_t
                c_new = c_new * m_t

                out_ref[0, t_local] = h_new.astype(out_ref.dtype)
                h_sc[...] = h_new
                c_sc[...] = c_new
            return carry

        lax.fori_loop(0, TC, step, 0, unroll=True)

    return kernel


def _pick_batch_tile(b_pad):
    """b_pad is a multiple of 8; choose a sublane-aligned tile."""
    if b_pad <= 256:
        return b_pad
    for tb in (256, 128, 64, 32, 16, 8):
        if b_pad % tb == 0:
            return tb
    return 8


def _lstm_recurrence(gx, masks, h0, whh, *, T, H, TC):
    """Recurrence for all directions of one layer.

    gx:    (D, T_pad, B_pad, 4H) f32   precomputed input gates (+bias)
    masks: (T_pad, B_pad, 1)     f32
    h0:    (B_pad, H)            f32
    whh:   (D, H, 4H)            bf16
    Returns (D, T_pad, B_pad, H) f32.
    """
    D, T_pad, B_pad, G = gx.shape
    nc = T_pad // TC
    TB = _pick_batch_tile(B_pad)
    nb = B_pad // TB

    def t_blk(d, c):              # forward: c ; backward: nc-1-c
        return c + d * (nc - 1 - 2 * c)

    cost = pl.CostEstimate(
        flops=2 * D * T * B_pad * H * 4 * H,          # recurrent matmul only
        transcendentals=5 * D * T * B_pad * H,        # 4 gate tanh + tanh(c)
        bytes_accessed=(4 * gx.size + 4 * masks.size + 4 * h0.size
                        + 2 * whh.size + 4 * D * T_pad * B_pad * H),
    )

    return pl.pallas_call(
        _make_lstm_kernel(T, TC, H),
        out_shape=jax.ShapeDtypeStruct((D, T_pad, B_pad, H), jnp.float32),
        grid_spec=pltpu.PrefetchScalarGridSpec(
            num_scalar_prefetch=0,
            grid=(D, nb, nc),
            in_specs=[
                # precomputed input gates, streamed per (direction, chunk)
                pl.BlockSpec((1, TC, TB, G),
                             lambda d, b, c: (d, t_blk(d, c), b, 0)),
                # masks (T,B,1) -> broadcast over H inside the kernel
                pl.BlockSpec((TC, TB, 1),
                             lambda d, b, c: (t_blk(d, c), b, 0)),
                # recurrent weight, VMEM-resident (constant index along b, c)
                pl.BlockSpec((1, H, G), lambda d, b, c: (d, 0, 0)),
                # initial hidden state (read only at chunk 0)
                pl.BlockSpec((TB, H), lambda d, b, c: (b, 0)),
            ],
            out_specs=pl.BlockSpec((1, TC, TB, H),
                                   lambda d, b, c: (d, t_blk(d, c), b, 0)),
            scratch_shapes=[
                pltpu.VMEM((TB, H), jnp.float32),   # h state
                pltpu.VMEM((TB, H), jnp.float32),   # c state
            ],
        ),
        compiler_params=pltpu.CompilerParams(
            # direction & batch tiles are independent -> "parallel" (megacore);
            # the time-chunk axis is a true recurrence -> "arbitrary".
            dimension_semantics=("parallel", "parallel", "arbitrary"),
        ),
        cost_estimate=cost,
    )(gx, masks, whh, h0)


# ----------------------------------------------------------------------------
# Parameter init (mirrors MyLSTM.__init__: orthonormal weights, zero biases)
# ----------------------------------------------------------------------------
def orthonormal_initializer(output_size, input_size, seed=0):
    """Deterministic (output_size, input_size) with orthonormal rows/columns."""
    rng = np.random.RandomState(seed)
    a = rng.randn(output_size, input_size)
    if output_size >= input_size:
        q, _ = np.linalg.qr(a)
    else:
        q, _ = np.linalg.qr(a.T)
        q = q.T
    assert q.shape == (output_size, input_size)
    return q.astype(np.float32)


def init_mylstm_params(input_size, hidden_size, num_layers=1,
                       bidirectional=False, seed=0):
    """Per layer: (W_ih^T packed (K, D*4H) bf16, W_hh^T (D, H, 4H) bf16,
    bias (D, 4H) f32).  Directions are packed along N so the input projection
    is a single 256-wide matmul for bidirectional H=32."""
    D = 2 if bidirectional else 1
    H = hidden_size
    params = []
    s = seed
    for layer in range(num_layers):
        layer_input = input_size if layer == 0 else hidden_size * D
        wih_cols, whh_stack = [], []
        for _d in range(D):
            w = orthonormal_initializer(4 * H, H + layer_input, seed=s)
            s += 1
            w_hh = w[:, :H]          # (4H, H)
            w_ih = w[:, H:]          # (4H, K)
            wih_cols.append(w_ih.T)  # (K, 4H)
            whh_stack.append(w_hh.T) # (H, 4H)
        wih = jnp.asarray(np.concatenate(wih_cols, axis=1), jnp.bfloat16)
        whh = jnp.asarray(np.stack(whh_stack, axis=0), jnp.bfloat16)
        bias = jnp.zeros((D, 4 * H), jnp.float32)
        params.append((wih, whh, bias))
    return params


# ----------------------------------------------------------------------------
# Forward wrapper (eval mode: no dropout)
# ----------------------------------------------------------------------------
def my_lstm_forward(x, masks, params, hidden_size, num_layers=1,
                    bidirectional=False, initial=None):
    """x: (T, B, input_size); masks: (T, B, 1) padding mask."""
    T, B, _ = x.shape
    H = hidden_size
    D = 2 if bidirectional else 1
    assert masks.shape == (T, B, 1)

    TC = T if T <= 16 else 16             # timesteps per grid step
    nc = pl.cdiv(T, TC)
    T_pad = nc * TC
    B_pad = ((B + 7) // 8) * 8            # full sublanes for the state tiles

    m = jnp.pad(masks.astype(jnp.float32),
                ((0, T_pad - T), (0, B_pad - B), (0, 0)))
    h0 = (jnp.zeros((B, H), jnp.float32) if initial is None
          else initial.astype(jnp.float32))
    h0 = jnp.pad(h0, ((0, B_pad - B), (0, 0)))

    cur = x.astype(jnp.float32)
    for layer in range(num_layers):
        wih, whh, bias = params[layer]
        K = cur.shape[-1]
        # Hoisted input projection: one big bf16 MXU matmul over all (t, b),
        # both directions packed along N.  Off the serial recurrence path.
        gx = jnp.dot(cur.reshape(T * B, K).astype(jnp.bfloat16), wih,
                     preferred_element_type=jnp.float32)            # (T*B, D*4H)
        gx = gx.reshape(T, B, D, 4 * H).transpose(2, 0, 1, 3)        # (D,T,B,4H)
        gx = gx + bias[:, None, None, :]
        gx = jnp.pad(gx, ((0, 0), (0, T_pad - T), (0, B_pad - B), (0, 0)))

        out = _lstm_recurrence(gx, m, h0, whh, T=T, H=H, TC=TC)      # (D,T_pad,B_pad,H)
        out = out[:, :T, :B, :]
        cur = jnp.concatenate([out[0], out[1]], axis=-1) if D == 2 else out[0]
    return cur.astype(x.dtype)


# ----------------------------------------------------------------------------
# Pure-JAX reference (same math / same bf16 matmul operands) for checking
# ----------------------------------------------------------------------------
def my_lstm_forward_ref(x, masks, params, hidden_size, num_layers=1,
                        bidirectional=False, initial=None):
    T, B, _ = x.shape
    H = hidden_size
    D = 2 if bidirectional else 1
    m = masks.astype(jnp.float32)
    h_zero = jnp.zeros((B, H), jnp.float32)
    init_h = h_zero if initial is None else initial.astype(jnp.float32)

    cur = x.astype(jnp.float32)
    for layer in range(num_layers):
        wih, whh, bias = params[layer]
        outs_dirs = []
        for d in range(D):
            wih_d = wih[:, d * 4 * H:(d + 1) * 4 * H]
            whh_d = whh[d]
            b_d = bias[d]
            order = range(T - 1, -1, -1) if d == 1 else range(T)
            h, c = init_h, h_zero
            outs = [None] * T
            for t in order:
                gates = (jnp.dot(cur[t].astype(jnp.bfloat16), wih_d,
                                 preferred_element_type=jnp.float32)
                         + jnp.dot(h.astype(jnp.bfloat16), whh_d,
                                   preferred_element_type=jnp.float32)
                         + b_d)
                i = _sigmoid(gates[:, 0 * H:1 * H])
                f = _sigmoid(gates[:, 1 * H:2 * H])
                g = jnp.tanh(gates[:, 2 * H:3 * H])
                o = _sigmoid(gates[:, 3 * H:4 * H])
                c = f * c + i * g
                h = o * jnp.tanh(c)
                h = h * m[t]
                c = c * m[t]
                outs[t] = h
            outs_dirs.append(jnp.stack(outs, 0))
        cur = jnp.concatenate(outs_dirs, axis=-1) if D == 2 else outs_dirs[0]
    return cur.astype(x.dtype)


if __name__ == "__main__":
    # Small shapes consistent with the module: seq=8, batch=2, input=32, hidden=32
    T, B, K, H = 8, 2, 32, 32

    key = jax.random.PRNGKey(0)
    x = jax.random.normal(key, (T, B, K), dtype=jnp.float32)

    # Padding-style masks (T, B, 1): last two timesteps of batch element 1 masked.
    masks = jnp.ones((T, B, 1), dtype=jnp.float32)
    masks = masks.at[T - 2:, 1, :].set(0.0)

    # --- unidirectional, 1 layer -------------------------------------------------
    params = init_mylstm_params(K, H, num_layers=1, bidirectional=False, seed=0)
    y = my_lstm_forward(x, masks, params, hidden_size=H,
                        num_layers=1, bidirectional=False)
    jax.block_until_ready(y)
    y_ref = my_lstm_forward_ref(x, masks, params, hidden_size=H,
                                num_layers=1, bidirectional=False)
    np.testing.assert_allclose(np.asarray(y), np.asarray(y_ref),
                               rtol=2e-3, atol=2e-3)

    # --- bidirectional, 2 layers -------------------------------------------------
    params_bi = init_mylstm_params(K, H, num_layers=2, bidirectional=True, seed=7)
    y_bi = my_lstm_forward(x, masks, params_bi, hidden_size=H,
                           num_layers=2, bidirectional=True)
    jax.block_until_ready(y_bi)
    y_bi_ref = my_lstm_forward_ref(x, masks, params_bi, hidden_size=H,
                                   num_layers=2, bidirectional=True)
    np.testing.assert_allclose(np.asarray(y_bi), np.asarray(y_bi_ref),
                               rtol=2e-3, atol=2e-3)

    print("KERNEL_OK")
</pallas_src>

<mosaic_0001>
module attributes {stable_mosaic.version = 11 : i64} {
  func.func @kernel(%arg0: i32, %arg1: i32, %arg2: i32, %arg3: memref<1x8x8x128xf32, #tpu.memory_space<vmem>>, %arg4: memref<8x8x1xf32, #tpu.memory_space<vmem>>, %arg5: memref<1x32x128xbf16, #tpu.memory_space<vmem>>, %arg6: memref<8x32xf32, #tpu.memory_space<vmem>>, %arg7: memref<1x8x8x32xf32, #tpu.memory_space<vmem>>, %arg8: memref<8x32xf32, #tpu.memory_space<vmem>>, %arg9: memref<8x32xf32, #tpu.memory_space<vmem>>) attributes {dimension_semantics = [#tpu.dimension_semantics<parallel>, #tpu.dimension_semantics<parallel>, #tpu.dimension_semantics<arbitrary>], iteration_bounds = array<i64: 1, 1, 1>, scalar_prefetch = 0 : i64, scratch_operands = 2 : i64, tpu.core_type = #tpu.core_type<tc>, window_params = [{transform_indices = @transform_0, window_bounds = array<i64: 1, 8, 8, 128>}, {transform_indices = @transform_1, window_bounds = array<i64: 8, 8, 1>}, {transform_indices = @transform_2, window_bounds = array<i64: 1, 32, 128>}, {transform_indices = @transform_3, window_bounds = array<i64: 8, 32>}, {transform_indices = @transform_4, window_bounds = array<i64: 1, 8, 8, 32>}]} {
    %c0_i32 = arith.constant 0 : i32
    %0 = arith.cmpi eq, %arg2, %c0_i32 : i32
    %1 = arith.extui %0 : i1 to i32
    %c0_i32_0 = arith.constant 0 : i32
    %2 = arith.cmpi ne, %1, %c0_i32_0 : i32
    scf.if %2 {
      %c0 = arith.constant 0 : index
      %c0_44 = arith.constant 0 : index
      %79 = vector.load %arg6[%c0, %c0_44] : memref<8x32xf32, #tpu.memory_space<vmem>>, vector<8x32xf32>
      %c0_45 = arith.constant 0 : index
      %c0_46 = arith.constant 0 : index
      %80 = vector.load %arg8[%c0_45, %c0_46] : memref<8x32xf32, #tpu.memory_space<vmem>>, vector<8x32xf32>
      tpu.vector_store %arg8[%c0_45, %c0_46], %79 {strides = array<i32>} : memref<8x32xf32, #tpu.memory_space<vmem>>, vector<8x32xf32>,
      %cst = arith.constant 0.000000e+00 : f32
      %81 = vector.broadcast %cst : f32 to vector<8x32xf32>
      %c0_47 = arith.constant 0 : index
      %c0_48 = arith.constant 0 : index
      %82 = vector.load %arg9[%c0_47, %c0_48] : memref<8x32xf32, #tpu.memory_space<vmem>>, vector<8x32xf32>
      tpu.vector_store %arg9[%c0_47, %c0_48], %81 {strides = array<i32>} : memref<8x32xf32, #tpu.memory_space<vmem>>, vector<8x32xf32>,
    } else {
    }
    %c2_i32 = arith.constant 2 : i32
    %3 = arith.muli %c2_i32, %arg2 : i32
    %c0_i32_1 = arith.constant 0 : i32
    %4 = arith.subi %c0_i32_1, %3 : i32
    %5 = arith.muli %arg0, %4 : i32
    %6 = arith.addi %arg2, %5 : i32
    %c0_i32_2 = arith.constant 0 : i32
    %c2_i32_3 = arith.constant 2 : i32
    %7 = arith.muli %c2_i32_3, %c0_i32_2 : i32
    %c7_i32 = arith.constant 7 : i32
    %8 = arith.subi %c7_i32, %7 : i32
    %9 = arith.muli %arg0, %8 : i32
    %10 = arith.addi %c0_i32_2, %9 : i32
    %c8_i32 = arith.constant 8 : i32
    %11 = arith.muli %6, %c8_i32 : i32
    %12 = arith.addi %11, %10 : i32
    %c8_i32_4 = arith.constant 8 : i32
    %13 = arith.cmpi slt, %12, %c8_i32_4 : i32
    %14 = arith.extui %13 : i1 to i32
    %c0_i32_5 = arith.constant 0 : i32
    %15 = arith.cmpi ne, %14, %c0_i32_5 : i32
    scf.if %15 {
      %c0 = arith.constant 0 : index
      %79 = arith.index_cast %10 : i32 to index
      %c0_44 = arith.constant 0 : index
      %c0_45 = arith.constant 0 : index
      %80 = vector.load %arg3[%c0, %79, %c0_44, %c0_45] : memref<1x8x8x128xf32, #tpu.memory_space<vmem>>, vector<1x1x8x128xf32>
      %81 = vector.shape_cast %80 : vector<1x1x8x128xf32> to vector<8x128xf32>
      %c0_46 = arith.constant 0 : index
      %c0_47 = arith.constant 0 : index
      %82 = vector.load %arg8[%c0_46, %c0_47] : memref<8x32xf32, #tpu.memory_space<vmem>>, vector<8x32xf32>
      %83 = arith.truncf %82 : vector<8x32xf32> to vector<8x32xbf16>
      %c0_48 = arith.constant 0 : index
      %c0_49 = arith.constant 0 : index
      %c0_50 = arith.constant 0 : index
      %84 = vector.load %arg5[%c0_48, %c0_49, %c0_50] : memref<1x32x128xbf16, #tpu.memory_space<vmem>>, vector<1x32x128xbf16>
      %85 = vector.shape_cast %84 : vector<1x32x128xbf16> to vector<32x128xbf16>
      %cst = arith.constant dense<0.000000e+00> : vector<8x128xf32>
      %86 = tpu.matmul %83, %85, %cst {dimension_numbers = #tpu.dot_dimension_numbers<[1], [0], [0], [1], [0, 0, 1, 1], [], []>} : vector<8x32xbf16>, vector<32x128xbf16>, vector<8x128xf32> -> vector<8x128xf32>
      %87 = arith.addf %81, %86 : vector<8x128xf32>
      %88 = vector.extract_strided_slice %87 {offsets = [0, 0], sizes = [8, 32], strides = [1, 1]} : vector<8x128xf32> to vector<8x32xf32>
      %cst_51 = arith.constant 5.000000e-01 : f32
      %89 = vector.broadcast %cst_51 : f32 to vector<8x32xf32>
      %90 = arith.mulf %89, %88 : vector<8x32xf32>
      %91 = math.tanh %90 : vector<8x32xf32>
      %cst_52 = arith.constant 5.000000e-01 : f32
      %92 = vector.broadcast %cst_52 : f32 to vector<8x32xf32>
      %93 = arith.mulf %92, %91 : vector<8x32xf32>
      %cst_53 = arith.constant 5.000000e-01 : f32
      %94 = vector.broadcast %cst_53 : f32 to vector<8x32xf32>
      %95 = arith.addf %93, %94 : vector<8x32xf32>
      %96 = vector.extract_strided_slice %87 {offsets = [0, 32], sizes = [8, 32], strides = [1, 1]} : vector<8x128xf32> to vector<8x32xf32>
      %cst_54 = arith.constant 5.000000e-01 : f32
      %97 = vector.broadcast %cst_54 : f32 to vector<8x32xf32>
      %98 = arith.mulf %97, %96 : vector<8x32xf32>
      %99 = math.tanh %98 : vector<8x32xf32>
      %cst_55 = arith.constant 5.000000e-01 : f32
      %100 = vector.broadcast %cst_55 : f32 to vector<8x32xf32>
      %101 = arith.mulf %100, %99 : vector<8x32xf32>
      %cst_56 = arith.constant 5.000000e-01 : f32
      %102 = vector.broadcast %cst_56 : f32 to vector<8x32xf32>
      %103 = arith.addf %101, %102 : vector<8x32xf32>
      %104 = vector.extract_strided_slice %87 {offsets = [0, 64], sizes = [8, 32], strides = [1, 1]} : vector<8x128xf32> to vector<8x32xf32>
      %105 = math.tanh %104 : vector<8x32xf32>
      %106 = vector.extract_strided_slice %87 {offsets = [0, 96], sizes = [8, 32], strides = [1, 1]} : vector<8x128xf32> to vector<8x32xf32>
      %cst_57 = arith.constant 5.000000e-01 : f32
      %107 = vector.broadcast %cst_57 : f32 to vector<8x32xf32>
      %108 = arith.mulf %107, %106 : vector<8x32xf32>
      %109 = math.tanh %108 : vector<8x32xf32>
      %cst_58 = arith.constant 5.000000e-01 : f32
      %110 = vector.broadcast %cst_58 : f32 to vector<8x32xf32>
      %111 = arith.mulf %110, %109 : vector<8x32xf32>
      %cst_59 = arith.constant 5.000000e-01 : f32
      %112 = vector.broadcast %cst_59 : f32 to vector<8x32xf32>
      %113 = arith.addf %111, %112 : vector<8x32xf32>
      %c0_60 = arith.constant 0 : index
      %c0_61 = arith.constant 0 : index
      %114 = vector.load %arg9[%c0_60, %c0_61] : memref<8x32xf32, #tpu.memory_space<vmem>>, vector<8x32xf32>
      %115 = arith.mulf %103, %114 : vector<8x32xf32>
      %116 = arith.mulf %95, %105 : vector<8x32xf32>
      %117 = arith.addf %115, %116 : vector<8x32xf32>
      %118 = math.tanh %117 : vector<8x32xf32>
      %119 = arith.mulf %113, %118 : vector<8x32xf32>
      %120 = arith.index_cast %10 : i32 to index
      %c0_62 = arith.constant 0 : index
      %c0_63 = arith.constant 0 : index
      %121 = vector.load %arg4[%120, %c0_62, %c0_63] : memref<8x8x1xf32, #tpu.memory_space<vmem>>, vector<1x8x1xf32>
      %122 = vector.shape_cast %121 : vector<1x8x1xf32> to vector<8x1xf32>
      %123 = vector.broadcast %122 : vector<8x1xf32> to vector<8x32xf32>
      %124 = arith.mulf %119, %123 : vector<8x32xf32>
      %125 = vector.broadcast %122 : vector<8x1xf32> to vector<8x32xf32>
      %126 = arith.mulf %117, %125 : vector<8x32xf32>
      %c0_64 = arith.constant 0 : index
      %127 = arith.index_cast %10 : i32 to index
      %c0_65 = arith.constant 0 : index
      %c0_66 = arith.constant 0 : index
      %128 = vector.load %arg7[%c0_64, %127, %c0_65, %c0_66] : memref<1x8x8x32xf32, #tpu.memory_space<vmem>>, vector<1x1x8x32xf32>
      %129 = vector.shape_cast %128 : vector<1x1x8x32xf32> to vector<8x32xf32>
      %130 = vector.shape_cast %124 : vector<8x32xf32> to vector<1x1x8x32xf32>
      tpu.vector_store %arg7[%c0_64, %127, %c0_65, %c0_66], %130 {strides = array<i32>} : memref<1x8x8x32xf32, #tpu.memory_space<vmem>>, vector<1x1x8x32xf32>,
      %c0_67 = arith.constant 0 : index
      %c0_68 = arith.constant 0 : index
      %131 = vector.load %arg8[%c0_67, %c0_68] : memref<8x32xf32, #tpu.memory_space<vmem>>, vector<8x32xf32>
      tpu.vector_store %arg8[%c0_67, %c0_68], %124 {strides = array<i32>} : memref<8x32xf32, #tpu.memory_space<vmem>>, vector<8x32xf32>,
      %c0_69 = arith.constant 0 : index
      %c0_70 = arith.constant 0 : index
      %132 = vector.load %arg9[%c0_69, %c0_70] : memref<8x32xf32, #tpu.memory_space<vmem>>, vector<8x32xf32>
      tpu.vector_store %arg9[%c0_69, %c0_70], %126 {strides = array<i32>} : memref<8x32xf32, #tpu.memory_space<vmem>>, vector<8x32xf32>,
    } else {
    }
    %c1_i32 = arith.constant 1 : i32
    %c2_i32_6 = arith.constant 2 : i32
    %16 = arith.muli %c2_i32_6, %c1_i32 : i32
    %c7_i32_7 = arith.constant 7 : i32
    %17 = arith.subi %c7_i32_7, %16 : i32
    %18 = arith.muli %arg0, %17 : i32
    %19 = arith.addi %c1_i32, %18 : i32
    %c8_i32_8 = arith.constant 8 : i32
    %20 = arith.muli %6, %c8_i32_8 : i32
    %21 = arith.addi %20, %19 : i32
    %c8_i32_9 = arith.constant 8 : i32
    %22 = arith.cmpi slt, %21, %c8_i32_9 : i32
    %23 = arith.extui %22 : i1 to i32
    %c0_i32_10 = arith.constant 0 : i32
    %24 = arith.cmpi ne, %23, %c0_i32_10 : i32
    scf.if %24 {
      %c0 = arith.constant 0 : index
      %79 = arith.index_cast %19 : i32 to index
      %c0_44 = arith.constant 0 : index
      %c0_45 = arith.constant 0 : index
      %80 = vector.load %arg3[%c0, %79, %c0_44, %c0_45] : memref<1x8x8x128xf32, #tpu.memory_space<vmem>>, vector<1x1x8x128xf32>
      %81 = vector.shape_cast %80 : vector<1x1x8x128xf32> to vector<8x128xf32>
      %c0_46 = arith.constant 0 : index
      %c0_47 = arith.constant 0 : index
      %82 = vector.load %arg8[%c0_46, %c0_47] : memref<8x32xf32, #tpu.memory_space<vmem>>, vector<8x32xf32>
      %83 = arith.truncf %82 : vector<8x32xf32> to vector<8x32xbf16>
      %c0_48 = arith.constant 0 : index
      %c0_49 = arith.constant 0 : index
      %c0_50 = arith.constant 0 : index
      %84 = vector.load %arg5[%c0_48, %c0_49, %c0_50] : memref<1x32x128xbf16, #tpu.memory_space<vmem>>, vector<1x32x128xbf16>
      %85 = vector.shape_cast %84 : vector<1x32x128xbf16> to vector<32x128xbf16>
      %cst = arith.constant dense<0.000000e+00> : vector<8x128xf32>
      %86 = tpu.matmul %83, %85, %cst {dimension_numbers = #tpu.dot_dimension_numbers<[1], [0], [0], [1], [0, 0, 1, 1], [], []>} : vector<8x32xbf16>, vector<32x128xbf16>, vector<8x128xf32> -> vector<8x128xf32>
      %87 = arith.addf %81, %86 : vector<8x128xf32>
      %88 = vector.extract_strided_slice %87 {offsets = [0, 0], sizes = [8, 32], strides = [1, 1]} : vector<8x128xf32> to vector<8x32xf32>
      %cst_51 = arith.constant 5.000000e-01 : f32
      %89 = vector.broadcast %cst_51 : f32 to vector<8x32xf32>
      %90 = arith.mulf %89, %88 : vector<8x32xf32>
      %91 = math.tanh %90 : vector<8x32xf32>
      %cst_52 = arith.constant 5.000000e-01 : f32
      %92 = vector.broadcast %cst_52 : f32 to vector<8x32xf32>
      %93 = arith.mulf %92, %91 : vector<8x32xf32>
      %cst_53 = arith.constant 5.000000e-01 : f32
      %94 = vector.broadcast %cst_53 : f32 to vector<8x32xf32>
      %95 = arith.addf %93, %94 : vector<8x32xf32>
      %96 = vector.extract_strided_slice %87 {offsets = [0, 32], sizes = [8, 32], strides = [1, 1]} : vector<8x128xf32> to vector<8x32xf32>
      %cst_54 = arith.constant 5.000000e-01 : f32
      %97 = vector.broadcast %cst_54 : f32 to vector<8x32xf32>
      %98 = arith.mulf %97, %96 : vector<8x32xf32>
      %99 = math.tanh %98 : vector<8x32xf32>
      %cst_55 = arith.constant 5.000000e-01 : f32
      %100 = vector.broadcast %cst_55 : f32 to vector<8x32xf32>
      %101 = arith.mulf %100, %99 : vector<8x32xf32>
      %cst_56 = arith.constant 5.000000e-01 : f32
      %102 = vector.broadcast %cst_56 : f32 to vector<8x32xf32>
      %103 = arith.addf %101, %102 : vector<8x32xf32>
      %104 = vector.extract_strided_slice %87 {offsets = [0, 64], sizes = [8, 32], strides = [1, 1]} : vector<8x128xf32> to vector<8x32xf32>
      %105 = math.tanh %104 : vector<8x32xf32>
      %106 = vector.extract_strided_slice %87 {offsets = [0, 96], sizes = [8, 32], strides = [1, 1]} : vector<8x128xf32> to vector<8x32xf32>
      %cst_57 = arith.constant 5.000000e-01 : f32
      %107 = vector.broadcast %cst_57 : f32 to vector<8x32xf32>
      %108 = arith.mulf %107, %106 : vector<8x32xf32>
      %109 = math.tanh %108 : vector<8x32xf32>
      %cst_58 = arith.constant 5.000000e-01 : f32
      %110 = vector.broadcast %cst_58 : f32 to vector<8x32xf32>
      %111 = arith.mulf %110, %109 : vector<8x32xf32>
      %cst_59 = arith.constant 5.000000e-01 : f32
      %112 = vector.broadcast %cst_59 : f32 to vector<8x32xf32>
      %113 = arith.addf %111, %112 : vector<8x32xf32>
      %c0_60 = arith.constant 0 : index
      %c0_61 = arith.constant 0 : index
      %114 = vector.load %arg9[%c0_60, %c0_61] : memref<8x32xf32, #tpu.memory_space<vmem>>, vector<8x32xf32>
      %115 = arith.mulf %103, %114 : vector<8x32xf32>
      %116 = arith.mulf %95, %105 : vector<8x32xf32>
      %117 = arith.addf %115, %116 : vector<8x32xf32>
      %118 = math.tanh %117 : vector<8x32xf32>
      %119 = arith.mulf %113, %118 : vector<8x32xf32>
      %120 = arith.index_cast %19 : i32 to index
      %c0_62 = arith.constant 0 : index
      %c0_63 = arith.constant 0 : index
      %121 = vector.load %arg4[%120, %c0_62, %c0_63] : memref<8x8x1xf32, #tpu.memory_space<vmem>>, vector<1x8x1xf32>
      %122 = vector.shape_cast %121 : vector<1x8x1xf32> to vector<8x1xf32>
      %123 = vector.broadcast %122 : vector<8x1xf32> to vector<8x32xf32>
      %124 = arith.mulf %119, %123 : vector<8x32xf32>
      %125 = vector.broadcast %122 : vector<8x1xf32> to vector<8x32xf32>
      %126 = arith.mulf %117, %125 : vector<8x32xf32>
      %c0_64 = arith.constant 0 : index
      %127 = arith.index_cast %19 : i32 to index
      %c0_65 = arith.constant 0 : index
      %c0_66 = arith.constant 0 : index
      %128 = vector.load %arg7[%c0_64, %127, %c0_65, %c0_66] : memref<1x8x8x32xf32, #tpu.memory_space<vmem>>, vector<1x1x8x32xf32>
      %129 = vector.shape_cast %128 : vector<1x1x8x32xf32> to vector<8x32xf32>
      %130 = vector.shape_cast %124 : vector<8x32xf32> to vector<1x1x8x32xf32>
      tpu.vector_store %arg7[%c0_64, %127, %c0_65, %c0_66], %130 {strides = array<i32>} : memref<1x8x8x32xf32, #tpu.memory_space<vmem>>, vector<1x1x8x32xf32>,
      %c0_67 = arith.constant 0 : index
      %c0_68 = arith.constant 0 : index
      %131 = vector.load %arg8[%c0_67, %c0_68] : memref<8x32xf32, #tpu.memory_space<vmem>>, vector<8x32xf32>
      tpu.vector_store %arg8[%c0_67, %c0_68], %124 {strides = array<i32>} : memref<8x32xf32, #tpu.memory_space<vmem>>, vector<8x32xf32>,
      %c0_69 = arith.constant 0 : index
      %c0_70 = arith.constant 0 : index
      %132 = vector.load %arg9[%c0_69, %c0_70] : memref<8x32xf32, #tpu.memory_space<vmem>>, vector<8x32xf32>
      tpu.vector_store %arg9[%c0_69, %c0_70], %126 {strides = array<i32>} : memref<8x32xf32, #tpu.memory_space<vmem>>, vector<8x32xf32>,
    } else {
    }
    %c2_i32_11 = arith.constant 2 : i32
    %c2_i32_12 = arith.constant 2 : i32
    %25 = arith.muli %c2_i32_12, %c2_i32_11 : i32
    %c7_i32_13 = arith.constant 7 : i32
    %26 = arith.subi %c7_i32_13, %25 : i32
    %27 = arith.muli %arg0, %26 : i32
    %28 = arith.addi %c2_i32_11, %27 : i32
    %c8_i32_14 = arith.constant 8 : i32
    %29 = arith.muli %6, %c8_i32_14 : i32
    %30 = arith.addi %29, %28 : i32
    %c8_i32_15 = arith.constant 8 : i32
    %31 = arith.cmpi slt, %30, %c8_i32_15 : i32
    %32 = arith.extui %31 : i1 to i32
    %c0_i32_16 = arith.constant 0 : i32
    %33 = arith.cmpi ne, %32, %c0_i32_16 : i32
    scf.if %33 {
      %c0 = arith.constant 0 : index
      %79 = arith.index_cast %28 : i32 to index
      %c0_44 = arith.constant 0 : index
      %c0_45 = arith.constant 0 : index
      %80 = vector.load %arg3[%c0, %79, %c0_44, %c0_45] : memref<1x8x8x128xf32, #tpu.memory_space<vmem>>, vector<1x1x8x128xf32>
      %81 = vector.shape_cast %80 : vector<1x1x8x128xf32> to vector<8x128xf32>
      %c0_46 = arith.constant 0 : index
      %c0_47 = arith.constant 0 : index
      %82 = vector.load %arg8[%c0_46, %c0_47] : memref<8x32xf32, #tpu.memory_space<vmem>>, vector<8x32xf32>
      %83 = arith.truncf %82 : vector<8x32xf32> to vector<8x32xbf16>
      %c0_48 = arith.constant 0 : index
      %c0_49 = arith.constant 0 : index
      %c0_50 = arith.constant 0 : index
      %84 = vector.load %arg5[%c0_48, %c0_49, %c0_50] : memref<1x32x128xbf16, #tpu.memory_space<vmem>>, vector<1x32x128xbf16>
      %85 = vector.shape_cast %84 : vector<1x32x128xbf16> to vector<32x128xbf16>
      %cst = arith.constant dense<0.000000e+00> : vector<8x128xf32>
      %86 = tpu.matmul %83, %85, %cst {dimension_numbers = #tpu.dot_dimension_numbers<[1], [0], [0], [1], [0, 0, 1, 1], [], []>} : vector<8x32xbf16>, vector<32x128xbf16>, vector<8x128xf32> -> vector<8x128xf32>
      %87 = arith.addf %81, %86 : vector<8x128xf32>
      %88 = vector.extract_strided_slice %87 {offsets = [0, 0], sizes = [8, 32], strides = [1, 1]} : vector<8x128xf32> to vector<8x32xf32>
      %cst_51 = arith.constant 5.000000e-01 : f32
      %89 = vector.broadcast %cst_51 : f32 to vector<8x32xf32>
      %90 = arith.mulf %89, %88 : vector<8x32xf32>
      %91 = math.tanh %90 : vector<8x32xf32>
      %cst_52 = arith.constant 5.000000e-01 : f32
      %92 = vector.broadcast %cst_52 : f32 to vector<8x32xf32>
      %93 = arith.mulf %92, %91 : vector<8x32xf32>
      %cst_53 = arith.constant 5.000000e-01 : f32
      %94 = vector.broadcast %cst_53 : f32 to vector<8x32xf32>
      %95 = arith.addf %93, %94 : vector<8x32xf32>
      %96 = vector.extract_strided_slice %87 {offsets = [0, 32], sizes = [8, 32], strides = [1, 1]} : vector<8x128xf32> to vector<8x32xf32>
      %cst_54 = arith.constant 5.000000e-01 : f32
      %97 = vector.broadcast %cst_54 : f32 to vector<8x32xf32>
      %98 = arith.mulf %97, %96 : vector<8x32xf32>
      %99 = math.tanh %98 : vector<8x32xf32>
      %cst_55 = arith.constant 5.000000e-01 : f32
      %100 = vector.broadcast %cst_55 : f32 to vector<8x32xf32>
      %101 = arith.mulf %100, %99 : vector<8x32xf32>
      %cst_56 = arith.constant 5.000000e-01 : f32
      %102 = vector.broadcast %cst_56 : f32 to vector<8x32xf32>
      %103 = arith.addf %101, %102 : vector<8x32xf32>
      %104 = vector.extract_strided_slice %87 {offsets = [0, 64], sizes = [8, 32], strides = [1, 1]} : vector<8x128xf32> to vector<8x32xf32>
      %105 = math.tanh %104 : vector<8x32xf32>
      %106 = vector.extract_strided_slice %87 {offsets = [0, 96], sizes = [8, 32], strides = [1, 1]} : vector<8x128xf32> to vector<8x32xf32>
      %cst_57 = arith.constant 5.000000e-01 : f32
      %107 = vector.broadcast %cst_57 : f32 to vector<8x32xf32>
      %108 = arith.mulf %107, %106 : vector<8x32xf32>
      %109 = math.tanh %108 : vector<8x32xf32>
      %cst_58 = arith.constant 5.000000e-01 : f32
      %110 = vector.broadcast %cst_58 : f32 to vector<8x32xf32>
      %111 = arith.mulf %110, %109 : vector<8x32xf32>
      %cst_59 = arith.constant 5.000000e-01 : f32
      %112 = vector.broadcast %cst_59 : f32 to vector<8x32xf32>
      %113 = arith.addf %111, %112 : vector<8x32xf32>
      %c0_60 = arith.constant 0 : index
      %c0_61 = arith.constant 0 : index
      %114 = vector.load %arg9[%c0_60, %c0_61] : memref<8x32xf32, #tpu.memory_space<vmem>>, vector<8x32xf32>
      %115 = arith.mulf %103, %114 : vector<8x32xf32>
      %116 = arith.mulf %95, %105 : vector<8x32xf32>
      %117 = arith.addf %115, %116 : vector<8x32xf32>
      %118 = math.tanh %117 : vector<8x32xf32>
      %119 = arith.mulf %113, %118 : vector<8x32xf32>
      %120 = arith.index_cast %28 : i32 to index
      %c0_62 = arith.constant 0 : index
      %c0_63 = arith.constant 0 : index
      %121 = vector.load %arg4[%120, %c0_62, %c0_63] : memref<8x8x1xf32, #tpu.memory_space<vmem>>, vector<1x8x1xf32>
      %122 = vector.shape_cast %121 : vector<1x8x1xf32> to vector<8x1xf32>
      %123 = vector.broadcast %122 : vector<8x1xf32> to vector<8x32xf32>
      %124 = arith.mulf %119, %123 : vector<8x32xf32>
      %125 = vector.broadcast %122 : vector<8x1xf32> to vector<8x32xf32>
      %126 = arith.mulf %117, %125 : vector<8x32xf32>
      %c0_64 = arith.constant 0 : index
      %127 = arith.index_cast %28 : i32 to index
      %c0_65 = arith.constant 0 : index
      %c0_66 = arith.constant 0 : index
      %128 = vector.load %arg7[%c0_64, %127, %c0_65, %c0_66] : memref<1x8x8x32xf32, #tpu.memory_space<vmem>>, vector<1x1x8x32xf32>
      %129 = vector.shape_cast %128 : vector<1x1x8x32xf32> to vector<8x32xf32>
      %130 = vector.shape_cast %124 : vector<8x32xf32> to vector<1x1x8x32xf32>
      tpu.vector_store %arg7[%c0_64, %127, %c0_65, %c0_66], %130 {strides = array<i32>} : memref<1x8x8x32xf32, #tpu.memory_space<vmem>>, vector<1x1x8x32xf32>,
      %c0_67 = arith.constant 0 : index
      %c0_68 = arith.constant 0 : index
      %131 = vector.load %arg8[%c0_67, %c0_68] : memref<8x32xf32, #tpu.memory_space<vmem>>, vector<8x32xf32>
      tpu.vector_store %arg8[%c0_67, %c0_68], %124 {strides = array<i32>} : memref<8x32xf32, #tpu.memory_space<vmem>>, vector<8x32xf32>,
      %c0_69 = arith.constant 0 : index
      %c0_70 = arith.constant 0 : index
      %132 = vector.load %arg9[%c0_69, %c0_70] : memref<8x32xf32, #tpu.memory_space<vmem>>, vector<8x32xf32>
      tpu.vector_store %arg9[%c0_69, %c0_70], %126 {strides = array<i32>} : memref<8x32xf32, #tpu.memory_space<vmem>>, vector<8x32xf32>,
    } else {
    }
    %c3_i32 = arith.constant 3 : i32
    %c2_i32_17 = arith.constant 2 : i32
    %34 = arith.muli %c2_i32_17, %c3_i32 : i32
    %c7_i32_18 = arith.constant 7 : i32
    %35 = arith.subi %c7_i32_18, %34 : i32
    %36 = arith.muli %arg0, %35 : i32
    %37 = arith.addi %c3_i32, %36 : i32
    %c8_i32_19 = arith.constant 8 : i32
    %38 = arith.muli %6, %c8_i32_19 : i32
    %39 = arith.addi %38, %37 : i32
    %c8_i32_20 = arith.constant 8 : i32
    %40 = arith.cmpi slt, %39, %c8_i32_20 : i32
    %41 = arith.extui %40 : i1 to i32
    %c0_i32_21 = arith.constant 0 : i32
    %42 = arith.cmpi ne, %41, %c0_i32_21 : i32
    scf.if %42 {
      %c0 = arith.constant 0 : index
      %79 = arith.index_cast %37 : i32 to index
      %c0_44 = arith.constant 0 : index
      %c0_45 = arith.constant 0 : index
      %80 = vector.load %arg3[%c0, %79, %c0_44, %c0_45] : memref<1x8x8x128xf32, #tpu.memory_space<vmem>>, vector<1x1x8x128xf32>
      %81 = vector.shape_cast %80 : vector<1x1x8x128xf32> to vector<8x128xf32>
      %c0_46 = arith.constant 0 : index
      %c0_47 = arith.constant 0 : index
      %82 = vector.load %arg8[%c0_46, %c0_47] : memref<8x32xf32, #tpu.memory_space<vmem>>, vector<8x32xf32>
      %83 = arith.truncf %82 : vector<8x32xf32> to vector<8x32xbf16>
      %c0_48 = arith.constant 0 : index
      %c0_49 = arith.constant 0 : index
      %c0_50 = arith.constant 0 : index
      %84 = vector.load %arg5[%c0_48, %c0_49, %c0_50] : memref<1x32x128xbf16, #tpu.memory_space<vmem>>, vector<1x32x128xbf16>
      %85 = vector.shape_cast %84 : vector<1x32x128xbf16> to vector<32x128xbf16>
      %cst = arith.constant dense<0.000000e+00> : vector<8x128xf32>
      %86 = tpu.matmul %83, %85, %cst {dimension_numbers = #tpu.dot_dimension_numbers<[1], [0], [0], [1], [0, 0, 1, 1], [], []>} : vector<8x32xbf16>, vector<32x128xbf16>, vector<8x128xf32> -> vector<8x128xf32>
      %87 = arith.addf %81, %86 : vector<8x128xf32>
      %88 = vector.extract_strided_slice %87 {offsets = [0, 0], sizes = [8, 32], strides = [1, 1]} : vector<8x128xf32> to vector<8x32xf32>
      %cst_51 = arith.constant 5.000000e-01 : f32
      %89 = vector.broadcast %cst_51 : f32 to vector<8x32xf32>
      %90 = arith.mulf %89, %88 : vector<8x32xf32>
      %91 = math.tanh %90 : vector<8x32xf32>
      %cst_52 = arith.constant 5.000000e-01 : f32
      %92 = vector.broadcast %cst_52 : f32 to vector<8x32xf32>
      %93 = arith.mulf %92, %91 : vector<8x32xf32>
      %cst_53 = arith.constant 5.000000e-01 : f32
      %94 = vector.broadcast %cst_53 : f32 to vector<8x32xf32>
      %95 = arith.addf %93, %94 : vector<8x32xf32>
      %96 = vector.extract_strided_slice %87 {offsets = [0, 32], sizes = [8, 32], strides = [1, 1]} : vector<8x128xf32> to vector<8x32xf32>
      %cst_54 = arith.constant 5.000000e-01 : f32
      %97 = vector.broadcast %cst_54 : f32 to vector<8x32xf32>
      %98 = arith.mulf %97, %96 : vector<8x32xf32>
      %99 = math.tanh %98 : vector<8x32xf32>
      %cst_55 = arith.constant 5.000000e-01 : f32
      %100 = vector.broadcast %cst_55 : f32 to vector<8x32xf32>
      %101 = arith.mulf %100, %99 : vector<8x32xf32>
      %cst_56 = arith.constant 5.000000e-01 : f32
      %102 = vector.broadcast %cst_56 : f32 to vector<8x32xf32>
      %103 = arith.addf %101, %102 : vector<8x32xf32>
      %104 = vector.extract_strided_slice %87 {offsets = [0, 64], sizes = [8, 32], strides = [1, 1]} : vector<8x128xf32> to vector<8x32xf32>
      %105 = math.tanh %104 : vector<8x32xf32>
      %106 = vector.extract_strided_slice %87 {offsets = [0, 96], sizes = [8, 32], strides = [1, 1]} : vector<8x128xf32> to vector<8x32xf32>
      %cst_57 = arith.constant 5.000000e-01 : f32
      %107 = vector.broadcast %cst_57 : f32 to vector<8x32xf32>
      %108 = arith.mulf %107, %106 : vector<8x32xf32>
      %109 = math.tanh %108 : vector<8x32xf32>
      %cst_58 = arith.constant 5.000000e-01 : f32
      %110 = vector.broadcast %cst_58 : f32 to vector<8x32xf32>
      %111 = arith.mulf %110, %109 : vector<8x32xf32>
      %cst_59 = arith.constant 5.000000e-01 : f32
      %112 = vector.broadcast %cst_59 : f32 to vector<8x32xf32>
      %113 = arith.addf %111, %112 : vector<8x32xf32>
      %c0_60 = arith.constant 0 : index
      %c0_61 = arith.constant 0 : index
      %114 = vector.load %arg9[%c0_60, %c0_61] : memref<8x32xf32, #tpu.memory_space<vmem>>, vector<8x32xf32>
      %115 = arith.mulf %103, %114 : vector<8x32xf32>
      %116 = arith.mulf %95, %105 : vector<8x32xf32>
      %117 = arith.addf %115, %116 : vector<8x32xf32>
      %118 = math.tanh %117 : vector<8x32xf32>
      %119 = arith.mulf %113, %118 : vector<8x32xf32>
      %120 = arith.index_cast %37 : i32 to index
      %c0_62 = arith.constant 0 : index
      %c0_63 = arith.constant 0 : index
      %121 = vector.load %arg4[%120, %c0_62, %c0_63] : memref<8x8x1xf32, #tpu.memory_space<vmem>>, vector<1x8x1xf32>
      %122 = vector.shape_cast %121 : vector<1x8x1xf32> to vector<8x1xf32>
      %123 = vector.broadcast %122 : vector<8x1xf32> to vector<8x32xf32>
      %124 = arith.mulf %119, %123 : vector<8x32xf32>
      %125 = vector.broadcast %122 : vector<8x1xf32> to vector<8x32xf32>
      %126 = arith.mulf %117, %125 : vector<8x32xf32>
      %c0_64 = arith.constant 0 : index
      %127 = arith.index_cast %37 : i32 to index
      %c0_65 = arith.constant 0 : index
      %c0_66 = arith.constant 0 : index
      %128 = vector.load %arg7[%c0_64, %127, %c0_65, %c0_66] : memref<1x8x8x32xf32, #tpu.memory_space<vmem>>, vector<1x1x8x32xf32>
      %129 = vector.shape_cast %128 : vector<1x1x8x32xf32> to vector<8x32xf32>
      %130 = vector.shape_cast %124 : vector<8x32xf32> to vector<1x1x8x32xf32>
      tpu.vector_store %arg7[%c0_64, %127, %c0_65, %c0_66], %130 {strides = array<i32>} : memref<1x8x8x32xf32, #tpu.memory_space<vmem>>, vector<1x1x8x32xf32>,
      %c0_67 = arith.constant 0 : index
      %c0_68 = arith.constant 0 : index
      %131 = vector.load %arg8[%c0_67, %c0_68] : memref<8x32xf32, #tpu.memory_space<vmem>>, vector<8x32xf32>
      tpu.vector_store %arg8[%c0_67, %c0_68], %124 {strides = array<i32>} : memref<8x32xf32, #tpu.memory_space<vmem>>, vector<8x32xf32>,
      %c0_69 = arith.constant 0 : index
      %c0_70 = arith.constant 0 : index
      %132 = vector.load %arg9[%c0_69, %c0_70] : memref<8x32xf32, #tpu.memory_space<vmem>>, vector<8x32xf32>
      tpu.vector_store %arg9[%c0_69, %c0_70], %126 {strides = array<i32>} : memref<8x32xf32, #tpu.memory_space<vmem>>, vector<8x32xf32>,
    } else {
    }
    %c4_i32 = arith.constant 4 : i32
    %c2_i32_22 = arith.constant 2 : i32
    %43 = arith.muli %c2_i32_22, %c4_i32 : i32
    %c7_i32_23 = arith.constant 7 : i32
    %44 = arith.subi %c7_i32_23, %43 : i32
    %45 = arith.muli %arg0, %44 : i32
    %46 = arith.addi %c4_i32, %45 : i32
    %c8_i32_24 = arith.constant 8 : i32
    %47 = arith.muli %6, %c8_i32_24 : i32
    %48 = arith.addi %47, %46 : i32
    %c8_i32_25 = arith.constant 8 : i32
    %49 = arith.cmpi slt, %48, %c8_i32_25 : i32
    %50 = arith.extui %49 : i1 to i32
    %c0_i32_26 = arith.constant 0 : i32
    %51 = arith.cmpi ne, %50, %c0_i32_26 : i32
    scf.if %51 {
      %c0 = arith.constant 0 : index
      %79 = arith.index_cast %46 : i32 to index
      %c0_44 = arith.constant 0 : index
      %c0_45 = arith.constant 0 : index
      %80 = vector.load %arg3[%c0, %79, %c0_44, %c0_45] : memref<1x8x8x128xf32, #tpu.memory_space<vmem>>, vector<1x1x8x128xf32>
      %81 = vector.shape_cast %80 : vector<1x1x8x128xf32> to vector<8x128xf32>
      %c0_46 = arith.constant 0 : index
      %c0_47 = arith.constant 0 : index
      %82 = vector.load %arg8[%c0_46, %c0_47] : memref<8x32xf32, #tpu.memory_space<vmem>>, vector<8x32xf32>
      %83 = arith.truncf %82 : vector<8x32xf32> to vector<8x32xbf16>
      %c0_48 = arith.constant 0 : index
      %c0_49 = arith.constant 0 : index
      %c0_50 = arith.constant 0 : index
      %84 = vector.load %arg5[%c0_48, %c0_49, %c0_50] : memref<1x32x128xbf16, #tpu.memory_space<vmem>>, vector<1x32x128xbf16>
      %85 = vector.shape_cast %84 : vector<1x32x128xbf16> to vector<32x128xbf16>
      %cst = arith.constant dense<0.000000e+00> : vector<8x128xf32>
      %86 = tpu.matmul %83, %85, %cst {dimension_numbers = #tpu.dot_dimension_numbers<[1], [0], [0], [1], [0, 0, 1, 1], [], []>} : vector<8x32xbf16>, vector<32x128xbf16>, vector<8x128xf32> -> vector<8x128xf32>
      %87 = arith.addf %81, %86 : vector<8x128xf32>
      %88 = vector.extract_strided_slice %87 {offsets = [0, 0], sizes = [8, 32], strides = [1, 1]} : vector<8x128xf32> to vector<8x32xf32>
      %cst_51 = arith.constant 5.000000e-01 : f32
      %89 = vector.broadcast %cst_51 : f32 to vector<8x32xf32>
      %90 = arith.mulf %89, %88 : vector<8x32xf32>
      %91 = math.tanh %90 : vector<8x32xf32>
      %cst_52 = arith.constant 5.000000e-01 : f32
      %92 = vector.broadcast %cst_52 : f32 to vector<8x32xf32>
      %93 = arith.mulf %92, %91 : vector<8x32xf32>
      %cst_53 = arith.constant 5.000000e-01 : f32
      %94 = vector.broadcast %cst_53 : f32 to vector<8x32xf32>
      %95 = arith.addf %93, %94 : vector<8x32xf32>
      %96 = vector.extract_strided_slice %87 {offsets = [0, 32], sizes = [8, 32], strides = [1, 1]} : vector<8x128xf32> to vector<8x32xf32>
      %cst_54 = arith.constant 5.000000e-01 : f32
      %97 = vector.broadcast %cst_54 : f32 to vector<8x32xf32>
      %98 = arith.mulf %97, %96 : vector<8x32xf32>
      %99 = math.tanh %98 : vector<8x32xf32>
      %cst_55 = arith.constant 5.000000e-01 : f32
      %100 = vector.broadcast %cst_55 : f32 to vector<8x32xf32>
      %101 = arith.mulf %100, %99 : vector<8x32xf32>
      %cst_56 = arith.constant 5.000000e-01 : f32
      %102 = vector.broadcast %cst_56 : f32 to vector<8x32xf32>
      %103 = arith.addf %101, %102 : vector<8x32xf32>
      %104 = vector.extract_strided_slice %87 {offsets = [0, 64], sizes = [8, 32], strides = [1, 1]} : vector<8x128xf32> to vector<8x32xf32>
      %105 = math.tanh %104 : vector<8x32xf32>
      %106 = vector.extract_strided_slice %87 {offsets = [0, 96], sizes = [8, 32], strides = [1, 1]} : vector<8x128xf32> to vector<8x32xf32>
      %cst_57 = arith.constant 5.000000e-01 : f32
      %107 = vector.broadcast %cst_57 : f32 to vector<8x32xf32>
      %108 = arith.mulf %107, %106 : vector<8x32xf32>
      %109 = math.tanh %108 : vector<8x32xf32>
      %cst_58 = arith.constant 5.000000e-01 : f32
      %110 = vector.broadcast %cst_58 : f32 to vector<8x32xf32>
      %111 = arith.mulf %110, %109 : vector<8x32xf32>
      %cst_59 = arith.constant 5.000000e-01 : f32
      %112 = vector.broadcast %cst_59 : f32 to vector<8x32xf32>
      %113 = arith.addf %111, %112 : vector<8x32xf32>
      %c0_60 = arith.constant 0 : index
      %c0_61 = arith.constant 0 : index
      %114 = vector.load %arg9[%c0_60, %c0_61] : memref<8x32xf32, #tpu.memory_space<vmem>>, vector<8x32xf32>
      %115 = arith.mulf %103, %114 : vector<8x32xf32>
      %116 = arith.mulf %95, %105 : vector<8x32xf32>
      %117 = arith.addf %115, %116 : vector<8x32xf32>
      %118 = math.tanh %117 : vector<8x32xf32>
      %119 = arith.mulf %113, %118 : vector<8x32xf32>
      %120 = arith.index_cast %46 : i32 to index
      %c0_62 = arith.constant 0 : index
      %c0_63 = arith.constant 0 : index
      %121 = vector.load %arg4[%120, %c0_62, %c0_63] : memref<8x8x1xf32, #tpu.memory_space<vmem>>, vector<1x8x1xf32>
      %122 = vector.shape_cast %121 : vector<1x8x1xf32> to vector<8x1xf32>
      %123 = vector.broadcast %122 : vector<8x1xf32> to vector<8x32xf32>
      %124 = arith.mulf %119, %123 : vector<8x32xf32>
      %125 = vector.broadcast %122 : vector<8x1xf32> to vector<8x32xf32>
      %126 = arith.mulf %117, %125 : vector<8x32xf32>
      %c0_64 = arith.constant 0 : index
      %127 = arith.index_cast %46 : i32 to index
      %c0_65 = arith.constant 0 : index
      %c0_66 = arith.constant 0 : index
      %128 = vector.load %arg7[%c0_64, %127, %c0_65, %c0_66] : memref<1x8x8x32xf32, #tpu.memory_space<vmem>>, vector<1x1x8x32xf32>
      %129 = vector.shape_cast %128 : vector<1x1x8x32xf32> to vector<8x32xf32>
      %130 = vector.shape_cast %124 : vector<8x32xf32> to vector<1x1x8x32xf32>
      tpu.vector_store %arg7[%c0_64, %127, %c0_65, %c0_66], %130 {strides = array<i32>} : memref<1x8x8x32xf32, #tpu.memory_space<vmem>>, vector<1x1x8x32xf32>,
      %c0_67 = arith.constant 0 : index
      %c0_68 = arith.constant 0 : index
      %131 = vector.load %arg8[%c0_67, %c0_68] : memref<8x32xf32, #tpu.memory_space<vmem>>, vector<8x32xf32>
      tpu.vector_store %arg8[%c0_67, %c0_68], %124 {strides = array<i32>} : memref<8x32xf32, #tpu.memory_space<vmem>>, vector<8x32xf32>,
      %c0_69 = arith.constant 0 : index
      %c0_70 = arith.constant 0 : index
      %132 = vector.load %arg9[%c0_69, %c0_70] : memref<8x32xf32, #tpu.memory_space<vmem>>, vector<8x32xf32>
      tpu.vector_store %arg9[%c0_69, %c0_70], %126 {strides = array<i32>} : memref<8x32xf32, #tpu.memory_space<vmem>>, vector<8x32xf32>,
    } else {
    }
    %c5_i32 = arith.constant 5 : i32
    %c2_i32_27 = arith.constant 2 : i32
    %52 = arith.muli %c2_i32_27, %c5_i32 : i32
    %c7_i32_28 = arith.constant 7 : i32
    %53 = arith.subi %c7_i32_28, %52 : i32
    %54 = arith.muli %arg0, %53 : i32
    %55 = arith.addi %c5_i32, %54 : i32
    %c8_i32_29 = arith.constant 8 : i32
    %56 = arith.muli %6, %c8_i32_29 : i32
    %57 = arith.addi %56, %55 : i32
    %c8_i32_30 = arith.constant 8 : i32
    %58 = arith.cmpi slt, %57, %c8_i32_30 : i32
    %59 = arith.extui %58 : i1 to i32
    %c0_i32_31 = arith.constant 0 : i32
    %60 = arith.cmpi ne, %59, %c0_i32_31 : i32
    scf.if %60 {
      %c0 = arith.constant 0 : index
      %79 = arith.index_cast %55 : i32 to index
      %c0_44 = arith.constant 0 : index
      %c0_45 = arith.constant 0 : index
      %80 = vector.load %arg3[%c0, %79, %c0_44, %c0_45] : memref<1x8x8x128xf32, #tpu.memory_space<vmem>>, vector<1x1x8x128xf32>
      %81 = vector.shape_cast %80 : vector<1x1x8x128xf32> to vector<8x128xf32>
      %c0_46 = arith.constant 0 : index
      %c0_47 = arith.constant 0 : index
      %82 = vector.load %arg8[%c0_46, %c0_47] : memref<8x32xf32, #tpu.memory_space<vmem>>, vector<8x32xf32>
      %83 = arith.truncf %82 : vector<8x32xf32> to vector<8x32xbf16>
      %c0_48 = arith.constant 0 : index
      %c0_49 = arith.constant 0 : index
      %c0_50 = arith.constant 0 : index
      %84 = vector.load %arg5[%c0_48, %c0_49, %c0_50] : memref<1x32x128xbf16, #tpu.memory_space<vmem>>, vector<1x32x128xbf16>
      %85 = vector.shape_cast %84 : vector<1x32x128xbf16> to vector<32x128xbf16>
      %cst = arith.constant dense<0.000000e+00> : vector<8x128xf32>
      %86 = tpu.matmul %83, %85, %cst {dimension_numbers = #tpu.dot_dimension_numbers<[1], [0], [0], [1], [0, 0, 1, 1], [], []>} : vector<8x32xbf16>, vector<32x128xbf16>, vector<8x128xf32> -> vector<8x128xf32>
      %87 = arith.addf %81, %86 : vector<8x128xf32>
      %88 = vector.extract_strided_slice %87 {offsets = [0, 0], sizes = [8, 32], strides = [1, 1]} : vector<8x128xf32> to vector<8x32xf32>
      %cst_51 = arith.constant 5.000000e-01 : f32
      %89 = vector.broadcast %cst_51 : f32 to vector<8x32xf32>
      %90 = arith.mulf %89, %88 : vector<8x32xf32>
      %91 = math.tanh %90 : vector<8x32xf32>
      %cst_52 = arith.constant 5.000000e-01 : f32
      %92 = vector.broadcast %cst_52 : f32 to vector<8x32xf32>
      %93 = arith.mulf %92, %91 : vector<8x32xf32>
      %cst_53 = arith.constant 5.000000e-01 : f32
      %94 = vector.broadcast %cst_53 : f32 to vector<8x32xf32>
      %95 = arith.addf %93, %94 : vector<8x32xf32>
      %96 = vector.extract_strided_slice %87 {offsets = [0, 32], sizes = [8, 32], strides = [1, 1]} : vector<8x128xf32> to vector<8x32xf32>
      %cst_54 = arith.constant 5.000000e-01 : f32
      %97 = vector.broadcast %cst_54 : f32 to vector<8x32xf32>
      %98 = arith.mulf %97, %96 : vector<8x32xf32>
      %99 = math.tanh %98 : vector<8x32xf32>
      %cst_55 = arith.constant 5.000000e-01 : f32
      %100 = vector.broadcast %cst_55 : f32 to vector<8x32xf32>
      %101 = arith.mulf %100, %99 : vector<8x32xf32>
      %cst_56 = arith.constant 5.000000e-01 : f32
      %102 = vector.broadcast %cst_56 : f32 to vector<8x32xf32>
      %103 = arith.addf %101, %102 : vector<8x32xf32>
      %104 = vector.extract_strided_slice %87 {offsets = [0, 64], sizes = [8, 32], strides = [1, 1]} : vector<8x128xf32> to vector<8x32xf32>
      %105 = math.tanh %104 : vector<8x32xf32>
      %106 = vector.extract_strided_slice %87 {offsets = [0, 96], sizes = [8, 32], strides = [1, 1]} : vector<8x128xf32> to vector<8x32xf32>
      %cst_57 = arith.constant 5.000000e-01 : f32
      %107 = vector.broadcast %cst_57 : f32 to vector<8x32xf32>
      %108 = arith.mulf %107, %106 : vector<8x32xf32>
      %109 = math.tanh %108 : vector<8x32xf32>
      %cst_58 = arith.constant 5.000000e-01 : f32
      %110 = vector.broadcast %cst_58 : f32 to vector<8x32xf32>
      %111 = arith.mulf %110, %109 : vector<8x32xf32>
      %cst_59 = arith.constant 5.000000e-01 : f32
      %112 = vector.broadcast %cst_59 : f32 to vector<8x32xf32>
      %113 = arith.addf %111, %112 : vector<8x32xf32>
      %c0_60 = arith.constant 0 : index
      %c0_61 = arith.constant 0 : index
      %114 = vector.load %arg9[%c0_60, %c0_61] : memref<8x32xf32, #tpu.memory_space<vmem>>, vector<8x32xf32>
      %115 = arith.mulf %103, %114 : vector<8x32xf32>
      %116 = arith.mulf %95, %105 : vector<8x32xf32>
      %117 = arith.addf %115, %116 : vector<8x32xf32>
      %118 = math.tanh %117 : vector<8x32xf32>
      %119 = arith.mulf %113, %118 : vector<8x32xf32>
      %120 = arith.index_cast %55 : i32 to index
      %c0_62 = arith.constant 0 : index
      %c0_63 = arith.constant 0 : index
      %121 = vector.load %arg4[%120, %c0_62, %c0_63] : memref<8x8x1xf32, #tpu.memory_space<vmem>>, vector<1x8x1xf32>
      %122 = vector.shape_cast %121 : vector<1x8x1xf32> to vector<8x1xf32>
      %123 = vector.broadcast %122 : vector<8x1xf32> to vector<8x32xf32>
      %124 = arith.mulf %119, %123 : vector<8x32xf32>
      %125 = vector.broadcast %122 : vector<8x1xf32> to vector<8x32xf32>
      %126 = arith.mulf %117, %125 : vector<8x32xf32>
      %c0_64 = arith.constant 0 : index
      %127 = arith.index_cast %55 : i32 to index
      %c0_65 = arith.constant 0 : index
      %c0_66 = arith.constant 0 : index
      %128 = vector.load %arg7[%c0_64, %127, %c0_65, %c0_66] : memref<1x8x8x32xf32, #tpu.memory_space<vmem>>, vector<1x1x8x32xf32>
      %129 = vector.shape_cast %128 : vector<1x1x8x32xf32> to vector<8x32xf32>
      %130 = vector.shape_cast %124 : vector<8x32xf32> to vector<1x1x8x32xf32>
      tpu.vector_store %arg7[%c0_64, %127, %c0_65, %c0_66], %130 {strides = array<i32>} : memref<1x8x8x32xf32, #tpu.memory_space<vmem>>, vector<1x1x8x32xf32>,
      %c0_67 = arith.constant 0 : index
      %c0_68 = arith.constant 0 : index
      %131 = vector.load %arg8[%c0_67, %c0_68] : memref<8x32xf32, #tpu.memory_space<vmem>>, vector<8x32xf32>
      tpu.vector_store %arg8[%c0_67, %c0_68], %124 {strides = array<i32>} : memref<8x32xf32, #tpu.memory_space<vmem>>, vector<8x32xf32>,
      %c0_69 = arith.constant 0 : index
      %c0_70 = arith.constant 0 : index
      %132 = vector.load %arg9[%c0_69, %c0_70] : memref<8x32xf32, #tpu.memory_space<vmem>>, vector<8x32xf32>
      tpu.vector_store %arg9[%c0_69, %c0_70], %126 {strides = array<i32>} : memref<8x32xf32, #tpu.memory_space<vmem>>, vector<8x32xf32>,
    } else {
    }
    %c6_i32 = arith.constant 6 : i32
    %c2_i32_32 = arith.constant 2 : i32
    %61 = arith.muli %c2_i32_32, %c6_i32 : i32
    %c7_i32_33 = arith.constant 7 : i32
    %62 = arith.subi %c7_i32_33, %61 : i32
    %63 = arith.muli %arg0, %62 : i32
    %64 = arith.addi %c6_i32, %63 : i32
    %c8_i32_34 = arith.constant 8 : i32
    %65 = arith.muli %6, %c8_i32_34 : i32
    %66 = arith.addi %65, %64 : i32
    %c8_i32_35 = arith.constant 8 : i32
    %67 = arith.cmpi slt, %66, %c8_i32_35 : i32
    %68 = arith.extui %67 : i1 to i32
    %c0_i32_36 = arith.constant 0 : i32
    %69 = arith.cmpi ne, %68, %c0_i32_36 : i32
    scf.if %69 {
      %c0 = arith.constant 0 : index
      %79 = arith.index_cast %64 : i32 to index
      %c0_44 = arith.constant 0 : index
      %c0_45 = arith.constant 0 : index
      %80 = vector.load %arg3[%c0, %79, %c0_44, %c0_45] : memref<1x8x8x128xf32, #tpu.memory_space<vmem>>, vector<1x1x8x128xf32>
      %81 = vector.shape_cast %80 : vector<1x1x8x128xf32> to vector<8x128xf32>
      %c0_46 = arith.constant 0 : index
      %c0_47 = arith.constant 0 : index
      %82 = vector.load %arg8[%c0_46, %c0_47] : memref<8x32xf32, #tpu.memory_space<vmem>>, vector<8x32xf32>
      %83 = arith.truncf %82 : vector<8x32xf32> to vector<8x32xbf16>
      %c0_48 = arith.constant 0 : index
      %c0_49 = arith.constant 0 : index
      %c0_50 = arith.constant 0 : index
      %84 = vector.load %arg5[%c0_48, %c0_49, %c0_50] : memref<1x32x128xbf16, #tpu.memory_space<vmem>>, vector<1x32x128xbf16>
      %85 = vector.shape_cast %84 : vector<1x32x128xbf16> to vector<32x128xbf16>
      %cst = arith.constant dense<0.000000e+00> : vector<8x128xf32>
      %86 = tpu.matmul %83, %85, %cst {dimension_numbers = #tpu.dot_dimension_numbers<[1], [0], [0], [1], [0, 0, 1, 1], [], []>} : vector<8x32xbf16>, vector<32x128xbf16>, vector<8x128xf32> -> vector<8x128xf32>
      %87 = arith.addf %81, %86 : vector<8x128xf32>
      %88 = vector.extract_strided_slice %87 {offsets = [0, 0], sizes = [8, 32], strides = [1, 1]} : vector<8x128xf32> to vector<8x32xf32>
      %cst_51 = arith.constant 5.000000e-01 : f32
      %89 = vector.broadcast %cst_51 : f32 to vector<8x32xf32>
      %90 = arith.mulf %89, %88 : vector<8x32xf32>
      %91 = math.tanh %90 : vector<8x32xf32>
      %cst_52 = arith.constant 5.000000e-01 : f32
      %92 = vector.broadcast %cst_52 : f32 to vector<8x32xf32>
      %93 = arith.mulf %92, %91 : vector<8x32xf32>
      %cst_53 = arith.constant 5.000000e-01 : f32
      %94 = vector.broadcast %cst_53 : f32 to vector<8x32xf32>
      %95 = arith.addf %93, %94 : vector<8x32xf32>
      %96 = vector.extract_strided_slice %87 {offsets = [0, 32], sizes = [8, 32], strides = [1, 1]} : vector<8x128xf32> to vector<8x32xf32>
      %cst_54 = arith.constant 5.000000e-01 : f32
      %97 = vector.broadcast %cst_54 : f32 to vector<8x32xf32>
      %98 = arith.mulf %97, %96 : vector<8x32xf32>
      %99 = math.tanh %98 : vector<8x32xf32>
      %cst_55 = arith.constant 5.000000e-01 : f32
      %100 = vector.broadcast %cst_55 : f32 to vector<8x32xf32>
      %101 = arith.mulf %100, %99 : vector<8x32xf32>
      %cst_56 = arith.constant 5.000000e-01 : f32
      %102 = vector.broadcast %cst_56 : f32 to vector<8x32xf32>
      %103 = arith.addf %101, %102 : vector<8x32xf32>
      %104 = vector.extract_strided_slice %87 {offsets = [0, 64], sizes = [8, 32], strides = [1, 1]} : vector<8x128xf32> to vector<8x32xf32>
      %105 = math.tanh %104 : vector<8x32xf32>
      %106 = vector.extract_strided_slice %87 {offsets = [0, 96], sizes = [8, 32], strides = [1, 1]} : vector<8x128xf32> to vector<8x32xf32>
      %cst_57 = arith.constant 5.000000e-01 : f32
      %107 = vector.broadcast %cst_57 : f32 to vector<8x32xf32>
      %108 = arith.mulf %107, %106 : vector<8x32xf32>
      %109 = math.tanh %108 : vector<8x32xf32>
      %cst_58 = arith.constant 5.000000e-01 : f32
      %110 = vector.broadcast %cst_58 : f32 to vector<8x32xf32>
      %111 = arith.mulf %110, %109 : vector<8x32xf32>
      %cst_59 = arith.constant 5.000000e-01 : f32
      %112 = vector.broadcast %cst_59 : f32 to vector<8x32xf32>
      %113 = arith.addf %111, %112 : vector<8x32xf32>
      %c0_60 = arith.constant 0 : index
      %c0_61 = arith.constant 0 : index
      %114 = vector.load %arg9[%c0_60, %c0_61] : memref<8x32xf32, #tpu.memory_space<vmem>>, vector<8x32xf32>
      %115 = arith.mulf %103, %114 : vector<8x32xf32>
      %116 = arith.mulf %95, %105 : vector<8x32xf32>
      %117 = arith.addf %115, %116 : vector<8x32xf32>
      %118 = math.tanh %117 : vector<8x32xf32>
      %119 = arith.mulf %113, %118 : vector<8x32xf32>
      %120 = arith.index_cast %64 : i32 to index
      %c0_62 = arith.constant 0 : index
      %c0_63 = arith.constant 0 : index
      %121 = vector.load %arg4[%120, %c0_62, %c0_63] : memref<8x8x1xf32, #tpu.memory_space<vmem>>, vector<1x8x1xf32>
      %122 = vector.shape_cast %121 : vector<1x8x1xf32> to vector<8x1xf32>
      %123 = vector.broadcast %122 : vector<8x1xf32> to vector<8x32xf32>
      %124 = arith.mulf %119, %123 : vector<8x32xf32>
      %125 = vector.broadcast %122 : vector<8x1xf32> to vector<8x32xf32>
      %126 = arith.mulf %117, %125 : vector<8x32xf32>
      %c0_64 = arith.constant 0 : index
      %127 = arith.index_cast %64 : i32 to index
      %c0_65 = arith.constant 0 : index
      %c0_66 = arith.constant 0 : index
      %128 = vector.load %arg7[%c0_64, %127, %c0_65, %c0_66] : memref<1x8x8x32xf32, #tpu.memory_space<vmem>>, vector<1x1x8x32xf32>
      %129 = vector.shape_cast %128 : vector<1x1x8x32xf32> to vector<8x32xf32>
      %130 = vector.shape_cast %124 : vector<8x32xf32> to vector<1x1x8x32xf32>
      tpu.vector_store %arg7[%c0_64, %127, %c0_65, %c0_66], %130 {strides = array<i32>} : memref<1x8x8x32xf32, #tpu.memory_space<vmem>>, vector<1x1x8x32xf32>,
      %c0_67 = arith.constant 0 : index
      %c0_68 = arith.constant 0 : index
      %131 = vector.load %arg8[%c0_67, %c0_68] : memref<8x32xf32, #tpu.memory_space<vmem>>, vector<8x32xf32>
      tpu.vector_store %arg8[%c0_67, %c0_68], %124 {strides = array<i32>} : memref<8x32xf32, #tpu.memory_space<vmem>>, vector<8x32xf32>,
      %c0_69 = arith.constant 0 : index
      %c0_70 = arith.constant 0 : index
      %132 = vector.load %arg9[%c0_69, %c0_70] : memref<8x32xf32, #tpu.memory_space<vmem>>, vector<8x32xf32>
      tpu.vector_store %arg9[%c0_69, %c0_70], %126 {strides = array<i32>} : memref<8x32xf32, #tpu.memory_space<vmem>>, vector<8x32xf32>,
    } else {
    }
    %c7_i32_37 = arith.constant 7 : i32
    %c2_i32_38 = arith.constant 2 : i32
    %70 = arith.muli %c2_i32_38, %c7_i32_37 : i32
    %c7_i32_39 = arith.constant 7 : i32
    %71 = arith.subi %c7_i32_39, %70 : i32
    %72 = arith.muli %arg0, %71 : i32
    %73 = arith.addi %c7_i32_37, %72 : i32
    %c8_i32_40 = arith.constant 8 : i32
    %74 = arith.muli %6, %c8_i32_40 : i32
    %75 = arith.addi %74, %73 : i32
    %c8_i32_41 = arith.constant 8 : i32
    %76 = arith.cmpi slt, %75, %c8_i32_41 : i32
    %77 = arith.extui %76 : i1 to i32
    %c0_i32_42 = arith.constant 0 : i32
    %78 = arith.cmpi ne, %77, %c0_i32_42 : i32
    scf.if %78 {
      %c0 = arith.constant 0 : index
      %79 = arith.index_cast %73 : i32 to index
      %c0_44 = arith.constant 0 : index
      %c0_45 = arith.constant 0 : index
      %80 = vector.load %arg3[%c0, %79, %c0_44, %c0_45] : memref<1x8x8x128xf32, #tpu.memory_space<vmem>>, vector<1x1x8x128xf32>
      %81 = vector.shape_cast %80 : vector<1x1x8x128xf32> to vector<8x128xf32>
      %c0_46 = arith.constant 0 : index
      %c0_47 = arith.constant 0 : index
      %82 = vector.load %arg8[%c0_46, %c0_47] : memref<8x32xf32, #tpu.memory_space<vmem>>, vector<8x32xf32>
      %83 = arith.truncf %82 : vector<8x32xf32> to vector<8x32xbf16>
      %c0_48 = arith.constant 0 : index
      %c0_49 = arith.constant 0 : index
      %c0_50 = arith.constant 0 : index
      %84 = vector.load %arg5[%c0_48, %c0_49, %c0_50] : memref<1x32x128xbf16, #tpu.memory_space<vmem>>, vector<1x32x128xbf16>
      %85 = vector.shape_cast %84 : vector<1x32x128xbf16> to vector<32x128xbf16>
      %cst = arith.constant dense<0.000000e+00> : vector<8x128xf32>
      %86 = tpu.matmul %83, %85, %cst {dimension_numbers = #tpu.dot_dimension_numbers<[1], [0], [0], [1], [0, 0, 1, 1], [], []>} : vector<8x32xbf16>, vector<32x128xbf16>, vector<8x128xf32> -> vector<8x128xf32>
      %87 = arith.addf %81, %86 : vector<8x128xf32>
      %88 = vector.extract_strided_slice %87 {offsets = [0, 0], sizes = [8, 32], strides = [1, 1]} : vector<8x128xf32> to vector<8x32xf32>
      %cst_51 = arith.constant 5.000000e-01 : f32
      %89 = vector.broadcast %cst_51 : f32 to vector<8x32xf32>
      %90 = arith.mulf %89, %88 : vector<8x32xf32>
      %91 = math.tanh %90 : vector<8x32xf32>
      %cst_52 = arith.constant 5.000000e-01 : f32
      %92 = vector.broadcast %cst_52 : f32 to vector<8x32xf32>
      %93 = arith.mulf %92, %91 : vector<8x32xf32>
      %cst_53 = arith.constant 5.000000e-01 : f32
      %94 = vector.broadcast %cst_53 : f32 to vector<8x32xf32>
      %95 = arith.addf %93, %94 : vector<8x32xf32>
      %96 = vector.extract_strided_slice %87 {offsets = [0, 32], sizes = [8, 32], strides = [1, 1]} : vector<8x128xf32> to vector<8x32xf32>
      %cst_54 = arith.constant 5.000000e-01 : f32
      %97 = vector.broadcast %cst_54 : f32 to vector<8x32xf32>
      %98 = arith.mulf %97, %96 : vector<8x32xf32>
      %99 = math.tanh %98 : vector<8x32xf32>
      %cst_55 = arith.constant 5.000000e-01 : f32
      %100 = vector.broadcast %cst_55 : f32 to vector<8x32xf32>
      %101 = arith.mulf %100, %99 : vector<8x32xf32>
      %cst_56 = arith.constant 5.000000e-01 : f32
      %102 = vector.broadcast %cst_56 : f32 to vector<8x32xf32>
      %103 = arith.addf %101, %102 : vector<8x32xf32>
      %104 = vector.extract_strided_slice %87 {offsets = [0, 64], sizes = [8, 32], strides = [1, 1]} : vector<8x128xf32> to vector<8x32xf32>
      %105 = math.tanh %104 : vector<8x32xf32>
      %106 = vector.extract_strided_slice %87 {offsets = [0, 96], sizes = [8, 32], strides = [1, 1]} : vector<8x128xf32> to vector<8x32xf32>
      %cst_57 = arith.constant 5.000000e-01 : f32
      %107 = vector.broadcast %cst_57 : f32 to vector<8x32xf32>
      %108 = arith.mulf %107, %106 : vector<8x32xf32>
      %109 = math.tanh %108 : vector<8x32xf32>
      %cst_58 = arith.constant 5.000000e-01 : f32
      %110 = vector.broadcast %cst_58 : f32 to vector<8x32xf32>
      %111 = arith.mulf %110, %109 : vector<8x32xf32>
      %cst_59 = arith.constant 5.000000e-01 : f32
      %112 = vector.broadcast %cst_59 : f32 to vector<8x32xf32>
      %113 = arith.addf %111, %112 : vector<8x32xf32>
      %c0_60 = arith.constant 0 : index
      %c0_61 = arith.constant 0 : index
      %114 = vector.load %arg9[%c0_60, %c0_61] : memref<8x32xf32, #tpu.memory_space<vmem>>, vector<8x32xf32>
      %115 = arith.mulf %103, %114 : vector<8x32xf32>
      %116 = arith.mulf %95, %105 : vector<8x32xf32>
      %117 = arith.addf %115, %116 : vector<8x32xf32>
      %118 = math.tanh %117 : vector<8x32xf32>
      %119 = arith.mulf %113, %118 : vector<8x32xf32>
      %120 = arith.index_cast %73 : i32 to index
      %c0_62 = arith.constant 0 : index
      %c0_63 = arith.constant 0 : index
      %121 = vector.load %arg4[%120, %c0_62, %c0_63] : memref<8x8x1xf32, #tpu.memory_space<vmem>>, vector<1x8x1xf32>
      %122 = vector.shape_cast %121 : vector<1x8x1xf32> to vector<8x1xf32>
      %123 = vector.broadcast %122 : vector<8x1xf32> to vector<8x32xf32>
      %124 = arith.mulf %119, %123 : vector<8x32xf32>
      %125 = vector.broadcast %122 : vector<8x1xf32> to vector<8x32xf32>
      %126 = arith.mulf %117, %125 : vector<8x32xf32>
      %c0_64 = arith.constant 0 : index
      %127 = arith.index_cast %73 : i32 to index
      %c0_65 = arith.constant 0 : index
      %c0_66 = arith.constant 0 : index
      %128 = vector.load %arg7[%c0_64, %127, %c0_65, %c0_66] : memref<1x8x8x32xf32, #tpu.memory_space<vmem>>, vector<1x1x8x32xf32>
      %129 = vector.shape_cast %128 : vector<1x1x8x32xf32> to vector<8x32xf32>
      %130 = vector.shape_cast %124 : vector<8x32xf32> to vector<1x1x8x32xf32>
      tpu.vector_store %arg7[%c0_64, %127, %c0_65, %c0_66], %130 {strides = array<i32>} : memref<1x8x8x32xf32, #tpu.memory_space<vmem>>, vector<1x1x8x32xf32>,
      %c0_67 = arith.constant 0 : index
      %c0_68 = arith.constant 0 : index
      %131 = vector.load %arg8[%c0_67, %c0_68] : memref<8x32xf32, #tpu.memory_space<vmem>>, vector<8x32xf32>
      tpu.vector_store %arg8[%c0_67, %c0_68], %124 {strides = array<i32>} : memref<8x32xf32, #tpu.memory_space<vmem>>, vector<8x32xf32>,
      %c0_69 = arith.constant 0 : index
      %c0_70 = arith.constant 0 : index
      %132 = vector.load %arg9[%c0_69, %c0_70] : memref<8x32xf32, #tpu.memory_space<vmem>>, vector<8x32xf32>
      tpu.vector_store %arg9[%c0_69, %c0_70], %126 {strides = array<i32>} : memref<8x32xf32, #tpu.memory_space<vmem>>, vector<8x32xf32>,
    } else {
    }
    %c8_i32_43 = arith.constant 8 : i32
    return
  }
  func.func @transform_0(%arg0: i32, %arg1: i32, %arg2: i32) -> (i32, i32, i32, i32) {
    %c2_i32 = arith.constant 2 : i32
    %0 = arith.muli %c2_i32, %arg2 : i32
    %c0_i32 = arith.constant 0 : i32
    %1 = arith.subi %c0_i32, %0 : i32
    %2 = arith.muli %arg0, %1 : i32
    %3 = arith.addi %arg2, %2 : i32
    %c0_i32_0 = arith.constant 0 : i32
    %c0_i32_1 = arith.constant 0 : i32
    return %arg0, %3, %arg1, %c0_i32_0 : i32, i32, i32, i32
  }
  func.func @transform_1(%arg0: i32, %arg1: i32, %arg2: i32) -> (i32, i32, i32) {
    %c2_i32 = arith.constant 2 : i32
    %0 = arith.muli %c2_i32, %arg2 : i32
    %c0_i32 = arith.constant 0 : i32
    %1 = arith.subi %c0_i32, %0 : i32
    %2 = arith.muli %arg0, %1 : i32
    %3 = arith.addi %arg2, %2 : i32
    %c0_i32_0 = arith.constant 0 : i32
    %c0_i32_1 = arith.constant 0 : i32
    return %3, %arg1, %c0_i32_0 : i32, i32, i32
  }
  func.func @transform_2(%arg0: i32, %arg1: i32, %arg2: i32) -> (i32, i32, i32) {
    %c0_i32 = arith.constant 0 : i32
    %c0_i32_0 = arith.constant 0 : i32
    %c0_i32_1 = arith.constant 0 : i32
    return %arg0, %c0_i32, %c0_i32_0 : i32, i32, i32
  }
  func.func @transform_3(%arg0: i32, %arg1: i32, %arg2: i32) -> (i32, i32) {
    %c0_i32 = arith.constant 0 : i32
    %c0_i32_0 = arith.constant 0 : i32
    return %arg1, %c0_i32 : i32, i32
  }
  func.func @transform_4(%arg0: i32, %arg1: i32, %arg2: i32) -> (i32, i32, i32, i32) {
    %c2_i32 = arith.constant 2 : i32
    %0 = arith.muli %c2_i32, %arg2 : i32
    %c0_i32 = arith.constant 0 : i32
    %1 = arith.subi %c0_i32, %0 : i32
    %2 = arith.muli %arg0, %1 : i32
    %3 = arith.addi %arg2, %2 : i32
    %c0_i32_0 = arith.constant 0 : i32
    %c0_i32_1 = arith.constant 0 : i32
    return %arg0, %3, %arg1, %c0_i32_0 : i32, i32, i32, i32
  }
}

</mosaic_0001>

<bundles_post_ra>
// kernel: tpu_custom_call.1
= control target key start
LH: loop header
LB: loop body
LE: loop exit
PB: predicated region body
PF: predicated region fallthrough
CT: control target
= control target key end

     0   :  { %9 = vsyncpa [#allocation5], 0  ;;  %s1332_s0 = inlined_call_operand.vmem [shape: f32[1,8,8,128], index: 0, kind: input, shape index: {}]   ;;  %s1333_s1 = inlined_call_operand.vmem [shape: f32[8,8,1], index: 1, kind: input, shape index: {}]   ;;  %s1334_s2 = inlined_call_operand.hbm [shape: bf16[1,32,128], index: 2, kind: input, shape index: {}]   ;;  %s1335_s3 = inlined_call_operand.vmem [shape: f32[8,32], index: 3, kind: input, shape index: {}]   ;;  %s1336_s4 = inlined_call_operand.hbm [shape: f32[1,8,8,32], index: 4, kind: output, shape index: {}]  }
   0x1   :  { %10 = vsyncpa [#allocation6], 0  ;;  %s47_s17 = sshll.u32 %s1334_s2, 4  ;;  %s1156_s18 = smov [#allocation4]   ;;  %s48_s17 = int_to_ptr.hbm [resolvable:$true] %s47_s17 }
   0x2   :  { %s49_s19 = sshll.u32 %s1156_s18, 4  ;;  %s1157_s20 = smov 64   ;;  %s50_s19 = int_to_ptr.vmem [resolvable:$true] %s49_s19 }
   0x3   :  { %s1158_s21 = smov 4  }
   0x4   :  { %55 = dma.hbm_to_vmem [thread:$0]  %s48_s17, 256, %s50_s19, [#allocation5], %s1157_s20, %s1157_s20, %s1158_s21  }
   0x5   :  { %1152 = dma.done.wait [#allocation5], 256  }
   0x6   :  { %1153 = vsyncadd [#allocation5], 4294967040  ;;  %vm119_vm0 = vcmask 261120   ;;  %v1028_v0 = vld [vmem:[#allocation4 + $0x8] sm:$0xff]  ;;  %v118_v1 = vld [vmem:[%s1335_s3] sm:$0xff]  ;;  %v1159_v5 = vmov 0.0  }
   0x7   :  { %120 = vst.msk [vmem:[#allocation2] sm:$0xff] %vm119_vm0, %v118_v1  ;;  %164 = vmatpush.bf16.msra.mxu0 %v1028_v0  ;;  %v1027_v2 = vld [vmem:[#allocation4] sm:$0xff]  ;;  %v135_v6 = vld [vmem:[%s1332_s0] sm:$0xff]  ;;  %s1160_s3 = smov 32   ;;  %v1161_v13 = vmov 0   ;;  %s1162_s27 = smov 96  }
   0x8   :  { %121 = vst.msk [vmem:[#allocation3] sm:$0xff] %vm119_vm0, %v1159_v5  ;;  %v200_v12 = vld [vmem:[%s1333_s1] sm:$0xff]  ;;  %1053 = vset.pattern.permute.xlu2 %v1161_v13  ;;  %1054 = vset.pattern.permute.xlu0 %v1161_v13  ;;  %v960_v32 = vld [vmem:[%s1333_s1 + $0x8] sm:$0xff]  ;;  %v1030_v33 = vld [vmem:[#allocation4 + $0x8] sm:$0xff]  ;;  %s889_s7 = sshll.u32 %s1336_s4, 4  ;;  %s890_s7 = int_to_ptr.hbm [resolvable:$true] %s889_s7 }
   0x9   :  { %203 = vperm.xlu2 %1053, %v200_v12   ;;  %1055 = vset.pattern.permute.xlu1 %v1161_v13  ;;  %v1029_v34 = vld [vmem:[#allocation4] sm:$0xff]  ;;  %v950_v38 = vld [vmem:[%s1332_s0 + $0x8] sm:$0xff]  ;;  %v1032_v61 = vld [vmem:[#allocation4 + $0x8] sm:$0xff] }
   0xa   :  { %258 = vmatpush.bf16.msra.mxu1 %v1030_v33  ;;  %352 = vmatpush.bf16.msra.mxu2 %v1032_v61  ;;  %v1031_v62 = vld [vmem:[#allocation4] sm:$0xff]  ;;  %v983_v61 = vld [vmem:[%s1332_s0 + $0x20] sm:$0xff] }
   0xb   :  { %165 = vmatpush.bf16.msra.mxu0 %v1027_v2  ;;  %v961_v2 = vld [vmem:[%s1332_s0 + $0x10] sm:$0xff] }
   0xe   :  { %v136_v3 = vld [vmem:[#allocation2] sm:$0xff]  ;;  %259 = vmatpush.bf16.msra.mxu1 %v1029_v34  ;;  %353 = vmatpush.bf16.msra.mxu2 %v1031_v62 }
   0xf   :  { %v137_v4 = vpack.c.bf16 %v136_v3, %v136_v3  ;;  %v177_v11 = vld [vmem:[#allocation3] sm:$0xff] }
  0x11   :  { %949 = vmatmul.msk.bf16.vlgmr.msra.gmra.mxu0 %vm119_vm0, %v137_v4 }
  0x63   :  { %v204_v23 = vpop.permute.xlu2 %203 }
  0x8e   :  { %v167_v7 = vpop.f32.mrf.mxu0 }
  0x8f   :  { %v171_v8 = vadd.f32 %v167_v7, %v135_v6  ;;  %v971_v7 = vld [vmem:[%s1333_s1 + $0x10] sm:$0xff] }
  0x91   :  { %1056 = vtanh.f32 %v171_v8  ;;  %v172_v14 = vmul.f32 0.5, %v171_v8 }
  0x93   :  { %1058 = vtanh.f32 %v172_v14 }
  0x96   :  { %v169_v9 = vpop.f32.mrf.mxu0 }
  0x97   :  { %v1057_v10 = vpop.eup %1056 }
  0x98   :  { %184 = vrot.lane.b32.xlu0 %v1057_v10, %s1157_s20 }
  0x99   :  { %v1059_v15 = vpop.eup %1058 }
  0x9a   :  { %v174_v16 = vmul.f32 0.5, %v1059_v15 }
  0x9c   :  { %v175_v17 = vadd.f32 0.5, %v174_v16 }
  0xa0   :  { %179 = vrot.lane.b32.xlu0 %v177_v11, %s1160_s3 }
 0x10a   :  { %v185_v18 = vpop.permute.xlu0 %184 }
 0x10b   :  { %v187_v19 = vmul.f32 %v185_v18, %v175_v17 }
 0x10d   :  { %189 = vrot.lane.b32.xlu1 %v187_v19, %s1160_s3 }
 0x112   :  { %v180_v20 = vpop.permute.xlu0 %179 }
 0x113   :  { %v182_v21 = vmul.f32 %v180_v20, %v175_v17 }
 0x17f   :  { %v190_v22 = vpop.permute.xlu1 %189 }
 0x180   :  { %v192_v24 = vadd.f32 %v190_v22, %v182_v21 }
 0x182   :  { %1060 = vtanh.f32 %v192_v24  ;;  %v207_v25 = vmul.f32 %v204_v23, %v192_v24 }
 0x184   :  { %216 = vrot.lane.b32.xlu0 %v207_v25, %s1162_s27 }
 0x188   :  { %v1061_v26 = vpop.eup %1060 }
 0x189   :  { %195 = vrot.lane.b32.xlu1 %v1061_v26, %s1157_s20  ;;  %v982_v26 = vld [vmem:[%s1333_s1 + $0x18] sm:$0xff] }
 0x1f6   :  { %v217_v27 = vpop.permute.xlu0 %216 }
 0x1f7   :  { %219 = vst.msk [vmem:[#allocation3] sm:$0xff] %vm119_vm0, %v217_v27  ;;  %v1034_v27 = vld [vmem:[#allocation4 + $0x8] sm:$0xff] }
 0x1f8   :  { %445 = vmatpush.bf16.msra.mxu3 %v1034_v27 }
 0x1fb   :  { %v196_v28 = vpop.permute.xlu1 %195 }
 0x1fc   :  { %v198_v29 = vmul.f32 %v196_v28, %v175_v17  ;;  %v1033_v28 = vld [vmem:[#allocation4] sm:$0xff] }
 0x1fd   :  { %446 = vmatpush.bf16.msra.mxu3 %v1033_v28 }
 0x1fe   :  { %v206_v30 = vmul.f32 %v204_v23, %v198_v29  ;;  %v271_v31 = vld [vmem:[#allocation3] sm:$0xff] }
 0x200   :  { %209 = vrot.lane.b32.xlu2 %v206_v30, %s1160_s3 }
 0x208   :  { %273 = vrot.lane.b32.xlu2 %v271_v31, %s1160_s3 }
 0x210   :  { %297 = vperm.xlu2 %1053, %v960_v32   ;;  %v972_v32 = vld [vmem:[%s1332_s0 + $0x18] sm:$0xff] }
 0x25a   :  { %v210_v35 = vpop.permute.xlu2 %209 }
 0x25b   :  { %213 = vst.msk [vmem:[#allocation7] sm:$0xff] %vm119_vm0, %v210_v35 }
 0x25c   :  { %214 = vst.msk [vmem:[#allocation2] sm:$0xff] %vm119_vm0, %v210_v35 }
 0x262   :  { %v274_v49 = vpop.permute.xlu2 %273 }
 0x263   :  { %v230_v36 = vld [vmem:[#allocation2] sm:$0xff] }
 0x264   :  { %v231_v37 = vpack.c.bf16 %v230_v36, %v230_v36 }
 0x266   :  { %959 = vmatmul.msk.bf16.vlgmr.msra.gmra.mxu1 %vm119_vm0, %v231_v37 }
 0x26a   :  { %v298_v54 = vpop.permute.xlu2 %297 }
 0x2e3   :  { %v261_v39 = vpop.f32.mrf.mxu1 }
 0x2e4   :  { %v265_v40 = vadd.f32 %v950_v38, %v261_v39 }
 0x2e6   :  { %1062 = vtanh.f32 %v265_v40  ;;  %v266_v43 = vmul.f32 0.5, %v265_v40 }
 0x2e8   :  { %1064 = vtanh.f32 %v266_v43 }
 0x2eb   :  { %v263_v41 = vpop.f32.mrf.mxu1 }
 0x2ec   :  { %v1063_v42 = vpop.eup %1062 }
 0x2ed   :  { %278 = vrot.lane.b32.xlu1 %v1063_v42, %s1157_s20 }
 0x2ee   :  { %v1065_v44 = vpop.eup %1064 }
 0x2ef   :  { %v268_v45 = vmul.f32 0.5, %v1065_v44 }
 0x2f1   :  { %v269_v46 = vadd.f32 0.5, %v268_v45 }
 0x2f3   :  { %v276_v50 = vmul.f32 %v274_v49, %v269_v46 }
 0x35f   :  { %v279_v47 = vpop.permute.xlu1 %278 }
 0x360   :  { %v281_v48 = vmul.f32 %v279_v47, %v269_v46 }
 0x362   :  { %283 = vrot.lane.b32.xlu0 %v281_v48, %s1160_s3 }
 0x3d4   :  { %v284_v51 = vpop.permute.xlu0 %283 }
 0x3d5   :  { %v286_v52 = vadd.f32 %v284_v51, %v276_v50  ;;  %v1036_v50 = vld [vmem:[#allocation4 + $0x8] sm:$0xff] }
 0x3d6   :  { %538 = vmatpush.bf16.msrb.mxu0 %v1036_v50  ;;  %v1015_v50 = vld [vmem:[%s1333_s1 + $0x30] sm:$0xff] }
 0x3d7   :  { %1066 = vtanh.f32 %v286_v52  ;;  %v301_v55 = vmul.f32 %v298_v54, %v286_v52 }
 0x3dd   :  { %v1067_v53 = vpop.eup %1066 }
 0x3de   :  { %289 = vrot.lane.b32.xlu1 %v1067_v53, %s1157_s20 }
 0x3e6   :  { %310 = vrot.lane.b32.xlu1 %v301_v55, %s1162_s27 }
 0x450   :  { %v290_v56 = vpop.permute.xlu1 %289 }
 0x451   :  { %v292_v57 = vmul.f32 %v290_v56, %v269_v46  ;;  %v993_v56 = vld [vmem:[%s1333_s1 + $0x20] sm:$0xff] }
 0x453   :  { %v300_v58 = vmul.f32 %v298_v54, %v292_v57  ;;  %v1035_v57 = vld [vmem:[#allocation4] sm:$0xff] }
 0x454   :  { %539 = vmatpush.bf16.msrb.mxu0 %v1035_v57 }
 0x455   :  { %303 = vrot.lane.b32.xlu0 %v300_v58, %s1160_s3 }
 0x458   :  { %v311_v59 = vpop.permute.xlu1 %310 }
 0x459   :  { %313 = vst.msk [vmem:[#allocation3] sm:$0xff] %vm119_vm0, %v311_v59 }
 0x460   :  { %v365_v60 = vld [vmem:[#allocation3] sm:$0xff] }
 0x461   :  { %367 = vrot.lane.b32.xlu0 %v365_v60, %s1160_s3 }
 0x469   :  { %391 = vperm.xlu0 %1054, %v971_v7  }
 0x4c7   :  { %v304_v63 = vpop.permute.xlu0 %303 }
 0x4c8   :  { %307 = vst.msk [vmem:[#allocation7 + $0x8] sm:$0xff] %vm119_vm0, %v304_v63 }
 0x4c9   :  { %308 = vst.msk [vmem:[#allocation2] sm:$0xff] %vm119_vm0, %v304_v63 }
 0x4d0   :  { %v324_v0 = vld [vmem:[#allocation2] sm:$0xff] }
 0x4d1   :  { %v325_v1 = vpack.c.bf16 %v324_v0, %v324_v0 }
 0x4d3   :  { %970 = vmatmul.msk.bf16.vlgmr.msra.gmra.mxu2 %vm119_vm0, %v325_v1  ;;  %v368_v14 = vpop.permute.xlu0 %367 }
 0x4db   :  { %v392_v19 = vpop.permute.xlu0 %391 }
 0x556   :  { %v355_v3 = vpop.f32.mrf.mxu2 }
 0x557   :  { %v359_v4 = vadd.f32 %v961_v2, %v355_v3 }
 0x559   :  { %1068 = vtanh.f32 %v359_v4  ;;  %v360_v8 = vmul.f32 0.5, %v359_v4 }
 0x55b   :  { %1070 = vtanh.f32 %v360_v8 }
 0x55e   :  { %v357_v5 = vpop.f32.mrf.mxu2 }
 0x55f   :  { %v1069_v6 = vpop.eup %1068 }
 0x560   :  { %372 = vrot.lane.b32.xlu2 %v1069_v6, %s1157_s20 }
 0x561   :  { %v1071_v9 = vpop.eup %1070 }
 0x562   :  { %v362_v10 = vmul.f32 0.5, %v1071_v9 }
 0x564   :  { %v363_v11 = vadd.f32 0.5, %v362_v10 }
 0x566   :  { %v370_v15 = vmul.f32 %v368_v14, %v363_v11 }
 0x5ba   :  { %v373_v12 = vpop.permute.xlu2 %372 }
 0x5bb   :  { %v375_v13 = vmul.f32 %v373_v12, %v363_v11 }
 0x5bd   :  { %377 = vrot.lane.b32.xlu1 %v375_v13, %s1160_s3 }
 0x62f   :  { %v378_v16 = vpop.permute.xlu1 %377 }
 0x630   :  { %v380_v17 = vadd.f32 %v378_v16, %v370_v15  ;;  %v1038_v15 = vld [vmem:[#allocation4 + $0x8] sm:$0xff] }
 0x631   :  { %632 = vmatpush.bf16.msrb.mxu1 %v1038_v15  ;;  %v1026_v15 = vld [vmem:[%s1333_s1 + $0x38] sm:$0xff] }
 0x632   :  { %1072 = vtanh.f32 %v380_v17  ;;  %v395_v20 = vmul.f32 %v392_v19, %v380_v17 }
 0x638   :  { %v1073_v18 = vpop.eup %1072 }
 0x639   :  { %383 = vrot.lane.b32.xlu2 %v1073_v18, %s1157_s20 }
 0x641   :  { %404 = vrot.lane.b32.xlu2 %v395_v20, %s1162_s27 }
 0x693   :  { %v384_v21 = vpop.permute.xlu2 %383 }
 0x694   :  { %v386_v22 = vmul.f32 %v384_v21, %v363_v11  ;;  %v1037_v21 = vld [vmem:[#allocation4] sm:$0xff] }
 0x695   :  { %633 = vmatpush.bf16.msrb.mxu1 %v1037_v21 }
 0x696   :  { %v394_v23 = vmul.f32 %v392_v19, %v386_v22 }
 0x698   :  { %397 = vrot.lane.b32.xlu1 %v394_v23, %s1160_s3 }
 0x69b   :  { %v405_v24 = vpop.permute.xlu2 %404 }
 0x69c   :  { %407 = vst.msk [vmem:[#allocation3] sm:$0xff] %vm119_vm0, %v405_v24 }
 0x6a3   :  { %v458_v25 = vld [vmem:[#allocation3] sm:$0xff] }
 0x6a4   :  { %460 = vrot.lane.b32.xlu2 %v458_v25, %s1160_s3  ;;  %v1004_v25 = vld [vmem:[%s1333_s1 + $0x28] sm:$0xff] }
 0x6ac   :  { %484 = vperm.xlu2 %1053, %v982_v26   ;;  %v994_v26 = vld [vmem:[%s1332_s0 + $0x28] sm:$0xff] }
 0x6fe   :  { %v461_v43 = vpop.permute.xlu2 %460 }
 0x706   :  { %v485_v48 = vpop.permute.xlu2 %484 }
 0x70a   :  { %v398_v29 = vpop.permute.xlu1 %397 }
 0x70b   :  { %401 = vst.msk [vmem:[#allocation7 + $0x10] sm:$0xff] %vm119_vm0, %v398_v29 }
 0x70c   :  { %402 = vst.msk [vmem:[#allocation2] sm:$0xff] %vm119_vm0, %v398_v29 }
 0x713   :  { %v417_v30 = vld [vmem:[#allocation2] sm:$0xff] }
 0x714   :  { %v418_v31 = vpack.c.bf16 %v417_v30, %v417_v30 }
 0x716   :  { %981 = vmatmul.msk.bf16.vlgmr.msra.gmra.mxu3 %vm119_vm0, %v418_v31 }
 0x799   :  { %v448_v33 = vpop.f32.mrf.mxu3 }
 0x79a   :  { %v452_v34 = vadd.f32 %v972_v32, %v448_v33 }
 0x79c   :  { %1074 = vtanh.f32 %v452_v34  ;;  %v453_v37 = vmul.f32 0.5, %v452_v34 }
 0x79e   :  { %1076 = vtanh.f32 %v453_v37 }
 0x7a1   :  { %v450_v35 = vpop.f32.mrf.mxu3 }
 0x7a2   :  { %v1075_v36 = vpop.eup %1074 }
 0x7a3   :  { %465 = vrot.lane.b32.xlu1 %v1075_v36, %s1157_s20 }
 0x7a4   :  { %v1077_v38 = vpop.eup %1076 }
 0x7a5   :  { %v455_v39 = vmul.f32 0.5, %v1077_v38 }
 0x7a7   :  { %v456_v40 = vadd.f32 0.5, %v455_v39 }
 0x7a9   :  { %v463_v44 = vmul.f32 %v461_v43, %v456_v40 }
 0x815   :  { %v466_v41 = vpop.permute.xlu1 %465 }
 0x816   :  { %v468_v42 = vmul.f32 %v466_v41, %v456_v40 }
 0x818   :  { %470 = vrot.lane.b32.xlu0 %v468_v42, %s1160_s3 }
 0x88a   :  { %v471_v45 = vpop.permute.xlu0 %470 }
 0x88b   :  { %v473_v46 = vadd.f32 %v471_v45, %v463_v44  ;;  %v1040_v44 = vld [vmem:[#allocation4 + $0x8] sm:$0xff] }
 0x88c   :  { %726 = vmatpush.bf16.msrb.mxu2 %v1040_v44 }
 0x88d   :  { %1078 = vtanh.f32 %v473_v46  ;;  %v488_v49 = vmul.f32 %v485_v48, %v473_v46 }
 0x893   :  { %v1079_v47 = vpop.eup %1078 }
 0x894   :  { %476 = vrot.lane.b32.xlu1 %v1079_v47, %s1157_s20 }
 0x89c   :  { %497 = vrot.lane.b32.xlu1 %v488_v49, %s1162_s27 }
 0x906   :  { %v477_v51 = vpop.permute.xlu1 %476 }
 0x907   :  { %v479_v52 = vmul.f32 %v477_v51, %v456_v40  ;;  %v1039_v51 = vld [vmem:[#allocation4] sm:$0xff] }
 0x908   :  { %727 = vmatpush.bf16.msrb.mxu2 %v1039_v51 }
 0x909   :  { %v487_v53 = vmul.f32 %v485_v48, %v479_v52 }
 0x90b   :  { %490 = vrot.lane.b32.xlu0 %v487_v53, %s1160_s3 }
 0x90e   :  { %v498_v54 = vpop.permute.xlu1 %497 }
 0x90f   :  { %500 = vst.msk [vmem:[#allocation3] sm:$0xff] %vm119_vm0, %v498_v54 }
 0x916   :  { %v551_v55 = vld [vmem:[#allocation3] sm:$0xff] }
 0x917   :  { %553 = vrot.lane.b32.xlu0 %v551_v55, %s1160_s3  ;;  %v1005_v55 = vld [vmem:[%s1332_s0 + $0x30] sm:$0xff] }
 0x91f   :  { %577 = vperm.xlu0 %1054, %v993_v56  }
 0x97d   :  { %v491_v58 = vpop.permute.xlu0 %490 }
 0x97e   :  { %494 = vst.msk [vmem:[#allocation7 + $0x18] sm:$0xff] %vm119_vm0, %v491_v58 }
 0x97f   :  { %495 = vst.msk [vmem:[#allocation2] sm:$0xff] %vm119_vm0, %v491_v58 }
 0x986   :  { %v510_v59 = vld [vmem:[#allocation2] sm:$0xff] }
 0x987   :  { %v511_v60 = vpack.c.bf16 %v510_v59, %v510_v59 }
 0x989   :  { %992 = vmatmul.msk.bf16.vlgmr.msrb.gmra.mxu0 %vm119_vm0, %v511_v60  ;;  %v554_v8 = vpop.permute.xlu0 %553 }
 0x991   :  { %v578_v13 = vpop.permute.xlu0 %577 }
 0xa06   :  { %v541_v62 = vpop.f32.mrf.mxu0 }
 0xa07   :  { %v545_v63 = vadd.f32 %v983_v61, %v541_v62 }
 0xa09   :  { %1080 = vtanh.f32 %v545_v63  ;;  %v546_v2 = vmul.f32 0.5, %v545_v63 }
 0xa0b   :  { %1082 = vtanh.f32 %v546_v2 }
 0xa0e   :  { %v543_v0 = vpop.f32.mrf.mxu0 }
 0xa0f   :  { %v1081_v1 = vpop.eup %1080 }
 0xa10   :  { %558 = vrot.lane.b32.xlu2 %v1081_v1, %s1157_s20 }
 0xa11   :  { %v1083_v3 = vpop.eup %1082 }
 0xa12   :  { %v548_v4 = vmul.f32 0.5, %v1083_v3 }
 0xa14   :  { %v549_v5 = vadd.f32 0.5, %v548_v4 }
 0xa16   :  { %v556_v9 = vmul.f32 %v554_v8, %v549_v5 }
 0xa6a   :  { %v559_v6 = vpop.permute.xlu2 %558 }
 0xa6b   :  { %v561_v7 = vmul.f32 %v559_v6, %v549_v5 }
 0xa6d   :  { %563 = vrot.lane.b32.xlu1 %v561_v7, %s1160_s3 }
 0xadf   :  { %v564_v10 = vpop.permute.xlu1 %563 }
 0xae0   :  { %v566_v11 = vadd.f32 %v564_v10, %v556_v9  ;;  %v1042_v9 = vld [vmem:[#allocation4 + $0x8] sm:$0xff] }
 0xae1   :  { %820 = vmatpush.bf16.msrb.mxu3 %v1042_v9 }
 0xae2   :  { %1084 = vtanh.f32 %v566_v11  ;;  %v581_v14 = vmul.f32 %v578_v13, %v566_v11 }
 0xae8   :  { %v1085_v12 = vpop.eup %1084 }
 0xae9   :  { %569 = vrot.lane.b32.xlu2 %v1085_v12, %s1157_s20 }
 0xaf1   :  { %590 = vrot.lane.b32.xlu2 %v581_v14, %s1162_s27 }
 0xb43   :  { %v570_v16 = vpop.permute.xlu2 %569 }
 0xb44   :  { %v572_v17 = vmul.f32 %v570_v16, %v549_v5  ;;  %v1041_v16 = vld [vmem:[#allocation4] sm:$0xff] }
 0xb45   :  { %821 = vmatpush.bf16.msrb.mxu3 %v1041_v16 }
 0xb46   :  { %v580_v18 = vmul.f32 %v578_v13, %v572_v17 }
 0xb48   :  { %583 = vrot.lane.b32.xlu1 %v580_v18, %s1160_s3 }
 0xb4b   :  { %v591_v19 = vpop.permute.xlu2 %590 }
 0xb4c   :  { %593 = vst.msk [vmem:[#allocation3] sm:$0xff] %vm119_vm0, %v591_v19 }
 0xb53   :  { %v645_v20 = vld [vmem:[#allocation3] sm:$0xff] }
 0xb54   :  { %647 = vrot.lane.b32.xlu1 %v645_v20, %s1160_s3  ;;  %v1016_v20 = vld [vmem:[%s1332_s0 + $0x38] sm:$0xff]  ;;  %s1163_s0 = smov [#allocation7]  }
 0xb55   :  { %s887_s1 = sshll.u32 %s1163_s0, 4  ;;  %s888_s1 = int_to_ptr.vmem [resolvable:$true] %s887_s1 }
 0xb5c   :  { %671 = vperm.xlu1 %1055, %v1004_v25  }
 0xbba   :  { %v584_v22 = vpop.permute.xlu1 %583 }
 0xbbb   :  { %587 = vst.msk [vmem:[#allocation7 + $0x20] sm:$0xff] %vm119_vm0, %v584_v22 }
 0xbbc   :  { %588 = vst.msk [vmem:[#allocation2] sm:$0xff] %vm119_vm0, %v584_v22 }
 0xbc3   :  { %v604_v23 = vld [vmem:[#allocation2] sm:$0xff] }
 0xbc4   :  { %v605_v24 = vpack.c.bf16 %v604_v23, %v604_v23 }
 0xbc6   :  { %1003 = vmatmul.msk.bf16.vlgmr.msrb.gmra.mxu1 %vm119_vm0, %v605_v24  ;;  %v648_v37 = vpop.permute.xlu1 %647 }
 0xbce   :  { %v672_v42 = vpop.permute.xlu1 %671 }
 0xc43   :  { %v635_v27 = vpop.f32.mrf.mxu1 }
 0xc44   :  { %v639_v28 = vadd.f32 %v994_v26, %v635_v27 }
 0xc46   :  { %1086 = vtanh.f32 %v639_v28  ;;  %v640_v31 = vmul.f32 0.5, %v639_v28 }
 0xc48   :  { %1088 = vtanh.f32 %v640_v31 }
 0xc4b   :  { %v637_v29 = vpop.f32.mrf.mxu1 }
 0xc4c   :  { %v1087_v30 = vpop.eup %1086 }
 0xc4d   :  { %652 = vrot.lane.b32.xlu0 %v1087_v30, %s1157_s20 }
 0xc4e   :  { %v1089_v32 = vpop.eup %1088 }
 0xc4f   :  { %v642_v33 = vmul.f32 0.5, %v1089_v32 }
 0xc51   :  { %v643_v34 = vadd.f32 0.5, %v642_v33 }
 0xc53   :  { %v650_v38 = vmul.f32 %v648_v37, %v643_v34 }
 0xcbf   :  { %v653_v35 = vpop.permute.xlu0 %652 }
 0xcc0   :  { %v655_v36 = vmul.f32 %v653_v35, %v643_v34 }
 0xcc2   :  { %657 = vrot.lane.b32.xlu2 %v655_v36, %s1160_s3 }
 0xd1c   :  { %v658_v39 = vpop.permute.xlu2 %657 }
 0xd1d   :  { %v660_v40 = vadd.f32 %v658_v39, %v650_v38 }
 0xd1f   :  { %1090 = vtanh.f32 %v660_v40  ;;  %v675_v43 = vmul.f32 %v672_v42, %v660_v40 }
 0xd25   :  { %v1091_v41 = vpop.eup %1090 }
 0xd26   :  { %663 = vrot.lane.b32.xlu0 %v1091_v41, %s1157_s20 }
 0xd2e   :  { %684 = vrot.lane.b32.xlu0 %v675_v43, %s1162_s27 }
 0xd98   :  { %v664_v45 = vpop.permute.xlu0 %663 }
 0xd99   :  { %v666_v46 = vmul.f32 %v664_v45, %v643_v34 }
 0xd9b   :  { %v674_v47 = vmul.f32 %v672_v42, %v666_v46 }
 0xd9d   :  { %677 = vrot.lane.b32.xlu2 %v674_v47, %s1160_s3 }
 0xda0   :  { %v685_v48 = vpop.permute.xlu0 %684 }
 0xda1   :  { %687 = vst.msk [vmem:[#allocation3] sm:$0xff] %vm119_vm0, %v685_v48 }
 0xda8   :  { %v739_v49 = vld [vmem:[#allocation3] sm:$0xff] }
 0xda9   :  { %741 = vrot.lane.b32.xlu2 %v739_v49, %s1160_s3 }
 0xdb1   :  { %765 = vperm.xlu2 %1053, %v1015_v50  }
 0xdf7   :  { %v678_v52 = vpop.permute.xlu2 %677 }
 0xdf8   :  { %681 = vst.msk [vmem:[#allocation7 + $0x28] sm:$0xff] %vm119_vm0, %v678_v52 }
 0xdf9   :  { %682 = vst.msk [vmem:[#allocation2] sm:$0xff] %vm119_vm0, %v678_v52 }
 0xe00   :  { %v698_v53 = vld [vmem:[#allocation2] sm:$0xff] }
 0xe01   :  { %v699_v54 = vpack.c.bf16 %v698_v53, %v698_v53 }
 0xe03   :  { %1014 = vmatmul.msk.bf16.vlgmr.msrb.gmra.mxu2 %vm119_vm0, %v699_v54  ;;  %v742_v2 = vpop.permute.xlu2 %741 }
 0xe0b   :  { %v766_v7 = vpop.permute.xlu2 %765 }
 0xe86   :  { %v729_v56 = vpop.f32.mrf.mxu2 }
 0xe87   :  { %v733_v57 = vadd.f32 %v1005_v55, %v729_v56 }
 0xe89   :  { %1092 = vtanh.f32 %v733_v57  ;;  %v734_v60 = vmul.f32 0.5, %v733_v57 }
 0xe8b   :  { %1094 = vtanh.f32 %v734_v60 }
 0xe8e   :  { %v731_v58 = vpop.f32.mrf.mxu2 }
 0xe8f   :  { %v1093_v59 = vpop.eup %1092 }
 0xe90   :  { %746 = vrot.lane.b32.xlu1 %v1093_v59, %s1157_s20 }
 0xe91   :  { %v1095_v61 = vpop.eup %1094 }
 0xe92   :  { %v736_v62 = vmul.f32 0.5, %v1095_v61 }
 0xe94   :  { %v737_v63 = vadd.f32 0.5, %v736_v62 }
 0xe96   :  { %v744_v3 = vmul.f32 %v742_v2, %v737_v63 }
 0xf02   :  { %v747_v0 = vpop.permute.xlu1 %746 }
 0xf03   :  { %v749_v1 = vmul.f32 %v747_v0, %v737_v63 }
 0xf05   :  { %751 = vrot.lane.b32.xlu0 %v749_v1, %s1160_s3 }
 0xf77   :  { %v752_v4 = vpop.permute.xlu0 %751 }
 0xf78   :  { %v754_v5 = vadd.f32 %v752_v4, %v744_v3 }
 0xf7a   :  { %1096 = vtanh.f32 %v754_v5  ;;  %v769_v8 = vmul.f32 %v766_v7, %v754_v5 }
 0xf80   :  { %v1097_v6 = vpop.eup %1096 }
 0xf81   :  { %757 = vrot.lane.b32.xlu1 %v1097_v6, %s1157_s20 }
 0xf89   :  { %778 = vrot.lane.b32.xlu1 %v769_v8, %s1162_s27 }
 0xff3   :  { %v758_v10 = vpop.permute.xlu1 %757 }
 0xff4   :  { %v760_v11 = vmul.f32 %v758_v10, %v737_v63 }
 0xff6   :  { %v768_v12 = vmul.f32 %v766_v7, %v760_v11 }
 0xff8   :  { %771 = vrot.lane.b32.xlu0 %v768_v12, %s1160_s3 }
 0xffb   :  { %v779_v13 = vpop.permute.xlu1 %778 }
 0xffc   :  { %781 = vst.msk [vmem:[#allocation3] sm:$0xff] %vm119_vm0, %v779_v13 }
0x1003   :  { %v833_v14 = vld [vmem:[#allocation3] sm:$0xff] }
0x1004   :  { %835 = vrot.lane.b32.xlu0 %v833_v14, %s1160_s3 }
0x100c   :  { %859 = vperm.xlu0 %1054, %v1026_v15  }
0x106a   :  { %v772_v17 = vpop.permute.xlu0 %771 }
0x106b   :  { %775 = vst.msk [vmem:[#allocation7 + $0x30] sm:$0xff] %vm119_vm0, %v772_v17 }
0x106c   :  { %776 = vst.msk [vmem:[#allocation2] sm:$0xff] %vm119_vm0, %v772_v17 }
0x1073   :  { %v792_v18 = vld [vmem:[#allocation2] sm:$0xff] }
0x1074   :  { %v793_v19 = vpack.c.bf16 %v792_v18, %v792_v18 }
0x1076   :  { %1025 = vmatmul.msk.bf16.vlgmr.msrb.gmra.mxu3 %vm119_vm0, %v793_v19  ;;  %v836_v31 = vpop.permute.xlu0 %835 }
0x107e   :  { %v860_v36 = vpop.permute.xlu0 %859 }
0x10f9   :  { %v823_v21 = vpop.f32.mrf.mxu3 }
0x10fa   :  { %v827_v22 = vadd.f32 %v1016_v20, %v823_v21 }
0x10fc   :  { %1098 = vtanh.f32 %v827_v22  ;;  %v828_v25 = vmul.f32 0.5, %v827_v22 }
0x10fe   :  { %1100 = vtanh.f32 %v828_v25 }
0x1101   :  { %v825_v23 = vpop.f32.mrf.mxu3 }
0x1102   :  { %v1099_v24 = vpop.eup %1098 }
0x1103   :  { %840 = vrot.lane.b32.xlu2 %v1099_v24, %s1157_s20 }
0x1104   :  { %v1101_v26 = vpop.eup %1100 }
0x1105   :  { %v830_v27 = vmul.f32 0.5, %v1101_v26 }
0x1107   :  { %v831_v28 = vadd.f32 0.5, %v830_v27 }
0x1109   :  { %v838_v32 = vmul.f32 %v836_v31, %v831_v28 }
0x115d   :  { %v841_v29 = vpop.permute.xlu2 %840 }
0x115e   :  { %v843_v30 = vmul.f32 %v841_v29, %v831_v28 }
0x1160   :  { %845 = vrot.lane.b32.xlu1 %v843_v30, %s1160_s3 }
0x11d2   :  { %v846_v33 = vpop.permute.xlu1 %845 }
0x11d3   :  { %v848_v34 = vadd.f32 %v846_v33, %v838_v32 }
0x11d5   :  { %1102 = vtanh.f32 %v848_v34  ;;  %v863_v37 = vmul.f32 %v860_v36, %v848_v34 }
0x11db   :  { %v1103_v35 = vpop.eup %1102 }
0x11dc   :  { %851 = vrot.lane.b32.xlu2 %v1103_v35, %s1157_s20  ;;  %s1164_s20 = smov 128  }
0x11e4   :  { %872 = vrot.lane.b32.xlu2 %v863_v37, %s1162_s27  ;;  %s1165_s27 = smov 8  }
0x1236   :  { %v852_v38 = vpop.permute.xlu2 %851 }
0x1237   :  { %v854_v39 = vmul.f32 %v852_v38, %v831_v28 }
0x1239   :  { %v862_v40 = vmul.f32 %v860_v36, %v854_v39 }
0x123b   :  { %865 = vrot.lane.b32.xlu1 %v862_v40, %s1160_s3 }
0x123e   :  { %v873_v41 = vpop.permute.xlu2 %872 }
0x123f   :  { %875 = vst.msk [vmem:[#allocation3] sm:$0xff] %vm119_vm0, %v873_v41 }
0x12ad   :  { %v866_v42 = vpop.permute.xlu1 %865 }
0x12ae   :  { %869 = vst.msk [vmem:[#allocation7 + $0x38] sm:$0xff] %vm119_vm0, %v866_v42 }
0x12af   :  { %870 = vst.msk [vmem:[#allocation2] sm:$0xff] %vm119_vm0, %v866_v42  ;;  %895 = dma.vmem_to_hbm [thread:$0]  %s888_s1, 1024, %s890_s7, [#allocation6], %s1164_s20, %s1164_s20, %s1165_s27  }
0x12b0   :  { %1154 = dma.done.wait [#allocation6], 1024  }
0x12b1   :  { %1155 = vsyncadd [#allocation6], 4294966272 }
0x12b2   :  { %900 = vsyncpa [#allocation5], 1 }
0x12b3   :  { %901 = vsyncpa [#allocation6], 1 }

</bundles_post_ra>
